<compile_context>
chip_gen: v5e
topology: v5e:2x2
jax: 0.10.0
libtpu: 0.0.40
codegen_flags: <defaults>
</compile_context>

<pallas_src>
import functools

import jax
import jax.numpy as jnp
from jax.experimental import pallas as pl
from jax.experimental.pallas import tpu as pltpu

EPS = 1e-5                       # PyTorch BatchNorm2d default


def _round_up(x, m):
    return ((x + m - 1) // m) * m


@functools.lru_cache(maxsize=None)
def _vmem_limit_bytes():
    """Generation-aware scoped-VMEM limit: ~3/4 of physical VMEM (96 MiB on
    v5e/v6e's 128 MiB, 48 MiB on v7x's 64 MiB); safe fallback if query fails."""
    cap = 64 * 1024 * 1024
    try:
        cap = int(pltpu.get_tpu_info().vmem_capacity_bytes)
    except Exception:
        pass
    return int(min(cap * 3 // 4, 96 * 1024 * 1024))


def _pick_row_tile(m, candidates):
    """Largest candidate row tile that divides m and leaves >= 2 blocks (so the
    'parallel' grid axis can feed both v7x TensorCores); falls back to any divisor,
    then to padding.  Candidates are multiples of 16 (bf16 sublane packing)."""
    for t in candidates:
        if m % t == 0 and m // t >= 2:
            return t, m
    for t in candidates:
        if m % t == 0:
            return t, m
    t = candidates[0] if m > candidates[0] else _round_up(m, 16)
    return t, _round_up(m, t)


# --------------------------------------------------------------------------- #
# Tiled matmul (bf16 MXU operands, f32 accumulation) + BN-stats epilogue
# --------------------------------------------------------------------------- #

def _matmul_stats_kernel(a_ref, b_ref, y_ref, stats_ref, acc_ref):
    k = pl.program_id(2)

    @pl.when(k == 0)
    def _():
        acc_ref[...] = jnp.zeros_like(acc_ref)

    acc_ref[...] += jnp.dot(a_ref[...], b_ref[...],
                            preferred_element_type=jnp.float32)

    @pl.when(k == pl.num_programs(2) - 1)
    def _():
        y = acc_ref[...]
        y_ref[...] = y.astype(y_ref.dtype)                       # bf16 writeback
        # per-channel partial sums for BatchNorm batch statistics (f32 accum)
        s1 = jnp.sum(y, axis=0, keepdims=True)                   # (1, tn)
        s2 = jnp.sum(y * y, axis=0, keepdims=True)               # (1, tn)
        stats_ref[...] = jnp.concatenate([s1, s2], axis=0)[None]  # (1, 2, tn)


def conv_matmul_stats(a, w_pad, count):
    """a: (M, Ka) bf16 activations, w_pad: (Kp, Cpad) bf16 weights (pre-transposed /
    zero-padded, Kp >= Ka).  Returns:
      y     : (M, Cpad) bf16 conv output,
      mean  : (Cpad,)   per-channel batch mean over the first `count` rows,
      var   : (Cpad,)   per-channel biased batch variance (clamped >= 0).
    Zero row/col padding is exact: padded rows/cols contribute 0 to sums."""
    m, ka = a.shape
    kp, cpd = w_pad.shape

    tm, mp = _pick_row_tile(m, (512, 256, 128, 64, 32, 16))
    tn = cpd if cpd <= 512 else 256           # collapse j axis for typical ResNet widths
    tk = next((c for c in (1024, 768, 512, 384, 256, 128) if kp >= c and kp % c == 0),
              kp)

    a_p = a if a.dtype == jnp.bfloat16 else a.astype(jnp.bfloat16)
    if mp != m or kp != ka:
        a_p = jnp.pad(a_p, ((0, mp - m), (0, kp - ka)))

    grid = (mp // tm, cpd // tn, kp // tk)

    cost = pl.CostEstimate(
        flops=2 * mp * cpd * kp,
        transcendentals=0,
        bytes_accessed=(mp * kp * 2 + grid[0] * kp * cpd * 2 + mp * cpd * 2
                        + grid[0] * 2 * cpd * 4))

    y, part = pl.pallas_call(
        _matmul_stats_kernel,
        out_shape=(jax.ShapeDtypeStruct((mp, cpd), jnp.bfloat16),
                   jax.ShapeDtypeStruct((grid[0], 2, cpd), jnp.float32)),
        grid_spec=pltpu.PrefetchScalarGridSpec(
            num_scalar_prefetch=0,
            grid=grid,
            in_specs=[pl.BlockSpec((tm, tk), lambda i, j, kk: (i, kk)),
                      pl.BlockSpec((tk, tn), lambda i, j, kk: (kk, j))],
            out_specs=[pl.BlockSpec((tm, tn), lambda i, j, kk: (i, j)),
                       pl.BlockSpec((1, 2, tn), lambda i, j, kk: (i, 0, j))],
            scratch_shapes=[pltpu.VMEM((tm, tn), jnp.float32)]),
        compiler_params=pltpu.CompilerParams(
            dimension_semantics=("parallel", "parallel", "arbitrary"),
            vmem_limit_bytes=_vmem_limit_bytes()),
        cost_estimate=cost,
    )(a_p, w_pad)

    sums = jnp.sum(part, axis=0)                        # (2, Cpad)
    mean = sums[0] / count
    var = jnp.maximum(sums[1] / count - mean * mean, 0.0)   # biased, clamped >= 0
    return y[:m], mean, var


# --------------------------------------------------------------------------- #
# Fused row-tiled elementwise kernels (BN apply / residual add / ReLU)
# --------------------------------------------------------------------------- #

def _bn_relu_kernel(x_ref, sc_ref, sh_ref, o_ref):
    y = x_ref[...].astype(jnp.float32) * sc_ref[...] + sh_ref[...]
    o_ref[...] = jnp.maximum(y, 0.0).astype(o_ref.dtype)


def _bn_add_relu_kernel(x_ref, s_ref, sc_ref, sh_ref, o_ref):
    # relu(bn(x) + identity_shortcut)
    y = (x_ref[...].astype(jnp.float32) * sc_ref[...] + sh_ref[...]
         + s_ref[...].astype(jnp.float32))
    o_ref[...] = jnp.maximum(y, 0.0).astype(o_ref.dtype)


def _bn2_add_relu_kernel(x_ref, s_ref, xsc_ref, xsh_ref, ssc_ref, ssh_ref, o_ref):
    # relu(bn(x) + bn(shortcut_conv))
    y = (x_ref[...].astype(jnp.float32) * xsc_ref[...] + xsh_ref[...]
         + s_ref[...].astype(jnp.float32) * ssc_ref[...] + ssh_ref[...])
    o_ref[...] = jnp.maximum(y, 0.0).astype(o_ref.dtype)


def _rowwise_pallas(kernel, row_arrays, vec_arrays, out_dtype=jnp.float32):
    """Run an elementwise kernel tiled over rows.  row_arrays: (M, C) tensors
    (bf16 or f32), vec_arrays: (C,) per-channel scale/shift vectors (broadcast
    inside kernel).  Output width = width of the first row array (lane-dense)."""
    m = row_arrays[0].shape[0]
    out_c = row_arrays[0].shape[1]
    rt, mp = _pick_row_tile(m, (2048, 1024, 512, 256, 128, 64, 32, 16))

    def pad_rows(a):
        return jnp.pad(a, ((0, mp - m), (0, 0))) if mp != m else a

    in_specs = ([pl.BlockSpec((rt, a.shape[1]), lambda i: (i, 0)) for a in row_arrays]
                + [pl.BlockSpec((1, v.shape[0]), lambda i: (0, 0)) for v in vec_arrays])
    args = [pad_rows(a) for a in row_arrays] + [v.reshape(1, -1) for v in vec_arrays]

    out = pl.pallas_call(
        kernel,
        out_shape=jax.ShapeDtypeStruct((mp, out_c), out_dtype),
        grid_spec=pltpu.PrefetchScalarGridSpec(
            num_scalar_prefetch=0,
            grid=(mp // rt,),
            in_specs=in_specs,
            out_specs=pl.BlockSpec((rt, out_c), lambda i: (i, 0))),
        compiler_params=pltpu.CompilerParams(
            dimension_semantics=("parallel",),
            vmem_limit_bytes=_vmem_limit_bytes()),
    )(*args)
    return out[:m]


# --------------------------------------------------------------------------- #
# Plain-JAX glue: im2col patch extraction and parameter preparation
# --------------------------------------------------------------------------- #

def _im2col_3x3(x_nhwc, stride, kpad):
    """3x3 / pad=1 im2col, emitted directly in the K-padded bf16 layout that the
    prepared weight expects (zero filler appended in the same concat, so no second
    pad pass over the patches tensor)."""
    # TODO(synk): fold the 9 taps into the matmul K grid axis (halo DMA into a VMEM
    # staging buffer) so this 9x copy is never materialized in HBM.
    n, h, w, cin = x_nhwc.shape
    ho = (h + 2 - 3) // stride + 1
    wo = (w + 2 - 3) // stride + 1
    xp = jnp.pad(x_nhwc, ((0, 0), (1, 1), (1, 1), (0, 0)))
    taps = []
    for ky in range(3):
        for kx in range(3):
            taps.append(xp[:, ky:ky + stride * (ho - 1) + 1:stride,
                           kx:kx + stride * (wo - 1) + 1:stride, :])
    fill = kpad - 9 * cin
    if fill > 0:
        taps.append(jnp.zeros((n, ho, wo, fill), x_nhwc.dtype))
    patches = jnp.concatenate(taps, axis=-1).reshape(n * ho * wo, kpad)
    return patches, (ho, wo)


def prepare_params(params, *, stride):
    """One-time weight prep: transpose to (K, Cout), zero-pad Cout to a multiple of
    256 and K to a multiple of 256 (128 for the tiny-K 1x1 shortcut), cast to bf16."""
    planes = params["conv1_w"].shape[0]
    in_planes = params["conv1_w"].shape[1]
    cp = _round_up(planes, 256)

    def prep_w(w_oihw, k_align):
        cout, cin_, kh, kw = w_oihw.shape
        k = kh * kw * cin_
        w2 = jnp.transpose(w_oihw, (2, 3, 1, 0)).reshape(k, cout).astype(jnp.bfloat16)
        kp = _round_up(k, k_align)
        return jnp.pad(w2, ((0, kp - k), (0, cp - cout)))

    def prep_v(v):
        return jnp.pad(v.astype(jnp.float32), (0, cp - v.shape[0]))

    weights = {
        "w1": prep_w(params["conv1_w"], 256),
        "g1": prep_v(params["norm1_g"]), "b1": prep_v(params["norm1_b"]),
        "w2": prep_w(params["conv2_w"], 256),
        "g2": prep_v(params["norm2_g"]), "b2": prep_v(params["norm2_b"]),
    }
    if stride != 1 or in_planes != planes:
        weights.update(
            ws=prep_w(params["sc_w"], 128),
            gs=prep_v(params["sc_g"]), bs=prep_v(params["sc_b"]))
    return weights


# --------------------------------------------------------------------------- #
# BasicBlock forward
# --------------------------------------------------------------------------- #

def basic_block_forward(x_nchw, weights, *, stride, planes):
    x = jnp.transpose(x_nchw, (0, 2, 3, 1))                      # NCHW -> NHWC
    n, h, w0, cin = x.shape
    cp = weights["w1"].shape[1]          # padded channel count (static)
    x_bf = x.astype(jnp.bfloat16)

    # out = relu(norm1(conv1(x)))  --- conv matmul + BN stats fused epilogue
    patches1, (ho, wo) = _im2col_3x3(x_bf, stride, weights["w1"].shape[0])
    m = n * ho * wo
    y1, mean1, var1 = conv_matmul_stats(patches1, weights["w1"], count=m)
    sc1 = weights["g1"] * jax.lax.rsqrt(var1 + EPS)
    sh1 = weights["b1"] - mean1 * sc1
    o1 = _rowwise_pallas(_bn_relu_kernel, [y1], [sc1, sh1],
                         out_dtype=jnp.bfloat16)                  # (m, cp) bf16

    # out = norm2(conv2(out))
    o1_nhwc = o1[:, :planes].reshape(n, ho, wo, planes)
    patches2, _ = _im2col_3x3(o1_nhwc, 1, weights["w2"].shape[0])
    y2, mean2, var2 = conv_matmul_stats(patches2, weights["w2"], count=m)
    sc2 = weights["g2"] * jax.lax.rsqrt(var2 + EPS)
    sh2 = weights["b2"] - mean2 * sc2

    # shortcut + residual add + final relu, fused into one row-tiled kernel
    if "ws" in weights:                   # downsample: conv1x1(stride) + BN
        xs = x_bf[:, ::stride, ::stride, :].reshape(m, cin)
        ys, means, vars_ = conv_matmul_stats(xs, weights["ws"], count=m)
        scs = weights["gs"] * jax.lax.rsqrt(vars_ + EPS)
        shs = weights["bs"] - means * scs
        out = _rowwise_pallas(_bn2_add_relu_kernel, [y2, ys],
                              [sc2, sh2, scs, shs])
    else:                                 # identity shortcut (stride==1, cin==planes)
        s_id = x_bf.reshape(m, cin)       # bf16, no extra f32 materialization
        if cin != cp:
            # TODO(synk): give the shortcut its own (rt, cin) BlockSpec and pad
            # in-VMEM so this small bf16 HBM pad disappears too.
            s_id = jnp.pad(s_id, ((0, 0), (0, cp - cin)))
        out = _rowwise_pallas(_bn_add_relu_kernel, [y2, s_id], [sc2, sh2])

    out = out[:, :planes].reshape(n, ho, wo, planes)
    return jnp.transpose(out, (0, 3, 1, 2)).astype(x_nchw.dtype)  # NHWC -> NCHW


# --------------------------------------------------------------------------- #
# f32 reference (loose self-check; bf16 MXU operands / bf16 y explain tolerance)
# --------------------------------------------------------------------------- #

def reference_forward(x, params, stride, has_downsample):
    def conv(z, w, s, p):
        return jax.lax.conv_general_dilated(
            z, w, (s, s), [(p, p), (p, p)],
            dimension_numbers=("NCHW", "OIHW", "NCHW"))

    def bn(z, g, b):
        mu = jnp.mean(z, axis=(0, 2, 3), keepdims=True)
        var = jnp.mean((z - mu) ** 2, axis=(0, 2, 3), keepdims=True)
        return ((z - mu) * jax.lax.rsqrt(var + EPS)
                * g[None, :, None, None] + b[None, :, None, None])

    out = jax.nn.relu(bn(conv(x, params["conv1_w"], stride, 1),
                         params["norm1_g"], params["norm1_b"]))
    out = bn(conv(out, params["conv2_w"], 1, 1),
             params["norm2_g"], params["norm2_b"])
    if has_downsample:
        sc = bn(conv(x, params["sc_w"], stride, 0),
                params["sc_g"], params["sc_b"])
    else:
        sc = x
    return jax.nn.relu(out + sc)


# --------------------------------------------------------------------------- #
# demo
# --------------------------------------------------------------------------- #

if __name__ == "__main__":
    key = jax.random.PRNGKey(0)
    k1, k2, kx1, kx2 = jax.random.split(key, 4)

    def make_params(k, in_planes, planes, downsample):
        ks = jax.random.split(k, 3)
        p = {
            "conv1_w": 0.1 * jax.random.normal(ks[0], (planes, in_planes, 3, 3),
                                               jnp.float32),
            "norm1_g": jnp.ones((planes,), jnp.float32),
            "norm1_b": jnp.zeros((planes,), jnp.float32),
            "conv2_w": 0.1 * jax.random.normal(ks[1], (planes, planes, 3, 3),
                                               jnp.float32),
            "norm2_g": jnp.ones((planes,), jnp.float32),
            "norm2_b": jnp.zeros((planes,), jnp.float32),
        }
        if downsample:
            p.update({
                "sc_w": 0.1 * jax.random.normal(ks[2], (planes, in_planes, 1, 1),
                                                jnp.float32),
                "sc_g": jnp.ones((planes,), jnp.float32),
                "sc_b": jnp.zeros((planes,), jnp.float32),
            })
        return p

    N, H, W = 2, 16, 16

    # --- Test 1: downsample shortcut (stride=2, in_planes != planes) -------- #
    in_planes, planes, stride = 4, 8, 2
    params = make_params(k1, in_planes, planes, True)
    x = jax.random.normal(kx1, (N, in_planes, H, W), jnp.float32)
    weights = prepare_params(params, stride=stride)
    fwd = jax.jit(functools.partial(basic_block_forward,
                                    stride=stride, planes=planes))
    out = fwd(x, weights)
    jax.block_until_ready(out)
    assert out.shape == (N, planes, H // stride, W // stride), out.shape
    assert bool(jnp.all(out >= 0.0))      # final ReLU
    ref = reference_forward(x, params, stride, True)
    err = float(jnp.max(jnp.abs(out - ref)))
    assert err < 0.3, f"downsample block: max abs err vs f32 reference = {err}"

    # --- Test 2: identity shortcut (stride=1, in_planes == planes) ---------- #
    in_planes2 = planes2 = 8
    params2 = make_params(k2, in_planes2, planes2, False)
    x2 = jax.random.normal(kx2, (N, in_planes2, H, W), jnp.float32)
    weights2 = prepare_params(params2, stride=1)
    fwd2 = jax.jit(functools.partial(basic_block_forward,
                                     stride=1, planes=planes2))
    out2 = fwd2(x2, weights2)
    jax.block_until_ready(out2)
    assert out2.shape == (N, planes2, H, W), out2.shape
    assert bool(jnp.all(out2 >= 0.0))
    ref2 = reference_forward(x2, params2, 1, False)
    err2 = float(jnp.max(jnp.abs(out2 - ref2)))
    assert err2 < 0.3, f"identity block: max abs err vs f32 reference = {err2}"

    print("KERNEL_OK")
</pallas_src>

<mosaic_0001>
module attributes {stable_mosaic.version = 11 : i64} {
  func.func @_matmul_stats_kernel(%arg0: i32, %arg1: i32, %arg2: i32, %arg3: memref<64x256xbf16, #tpu.memory_space<vmem>>, %arg4: memref<256x256xbf16, #tpu.memory_space<vmem>>, %arg5: memref<64x256xbf16, #tpu.memory_space<vmem>>, %arg6: memref<1x2x256xf32, #tpu.memory_space<vmem>>, %arg7: memref<64x256xf32, #tpu.memory_space<vmem>>) attributes {dimension_semantics = [#tpu.dimension_semantics<parallel>, #tpu.dimension_semantics<parallel>, #tpu.dimension_semantics<arbitrary>], iteration_bounds = array<i64: 2, 1, 1>, scalar_prefetch = 0 : i64, scratch_operands = 1 : i64, tpu.core_type = #tpu.core_type<tc>, window_params = [{transform_indices = @transform_0, window_bounds = array<i64: 64, 256>}, {transform_indices = @transform_1, window_bounds = array<i64: 256, 256>}, {transform_indices = @transform_2, window_bounds = array<i64: 64, 256>}, {transform_indices = @transform_3, window_bounds = array<i64: 1, 2, 256>}]} {
    %c0_i32 = arith.constant 0 : i32
    %0 = arith.cmpi eq, %arg2, %c0_i32 : i32
    %1 = arith.extui %0 : i1 to i32
    %c0_i32_0 = arith.constant 0 : i32
    %2 = arith.cmpi ne, %1, %c0_i32_0 : i32
    scf.if %2 {
      %cst_10 = arith.constant 0.000000e+00 : f32
      %12 = vector.broadcast %cst_10 : f32 to vector<64x256xf32>
      %c0_11 = arith.constant 0 : index
      %c0_12 = arith.constant 0 : index
      %13 = vector.load %arg7[%c0_11, %c0_12] : memref<64x256xf32, #tpu.memory_space<vmem>>, vector<64x256xf32>
      tpu.vector_store %arg7[%c0_11, %c0_12], %12 {strides = array<i32>} : memref<64x256xf32, #tpu.memory_space<vmem>>, vector<64x256xf32>,
    } else {
    }
    %c0 = arith.constant 0 : index
    %c0_1 = arith.constant 0 : index
    %3 = vector.load %arg7[%c0, %c0_1] : memref<64x256xf32, #tpu.memory_space<vmem>>, vector<64x256xf32>
    %c0_2 = arith.constant 0 : index
    %c0_3 = arith.constant 0 : index
    %4 = vector.load %arg3[%c0_2, %c0_3] : memref<64x256xbf16, #tpu.memory_space<vmem>>, vector<64x256xbf16>
    %c0_4 = arith.constant 0 : index
    %c0_5 = arith.constant 0 : index
    %5 = vector.load %arg4[%c0_4, %c0_5] : memref<256x256xbf16, #tpu.memory_space<vmem>>, vector<256x256xbf16>
    %cst = arith.constant dense<0.000000e+00> : vector<64x256xf32>
    %6 = tpu.matmul %4, %5, %cst {dimension_numbers = #tpu.dot_dimension_numbers<[1], [0], [0], [1], [0, 0, 1, 1], [], []>} : vector<64x256xbf16>, vector<256x256xbf16>, vector<64x256xf32> -> vector<64x256xf32>
    %7 = arith.addf %3, %6 : vector<64x256xf32>
    %c0_6 = arith.constant 0 : index
    %c0_7 = arith.constant 0 : index
    %8 = vector.load %arg7[%c0_6, %c0_7] : memref<64x256xf32, #tpu.memory_space<vmem>>, vector<64x256xf32>
    tpu.vector_store %arg7[%c0_6, %c0_7], %7 {strides = array<i32>} : memref<64x256xf32, #tpu.memory_space<vmem>>, vector<64x256xf32>,
    %c0_i32_8 = arith.constant 0 : i32
    %9 = arith.cmpi eq, %arg2, %c0_i32_8 : i32
    %10 = arith.extui %9 : i1 to i32
    %c0_i32_9 = arith.constant 0 : i32
    %11 = arith.cmpi ne, %10, %c0_i32_9 : i32
    scf.if %11 {
      %c0_10 = arith.constant 0 : index
      %c0_11 = arith.constant 0 : index
      %12 = vector.load %arg7[%c0_10, %c0_11] : memref<64x256xf32, #tpu.memory_space<vmem>>, vector<64x256xf32>
      %13 = arith.truncf %12 : vector<64x256xf32> to vector<64x256xbf16>
      %c0_12 = arith.constant 0 : index
      %c0_13 = arith.constant 0 : index
      %14 = vector.load %arg5[%c0_12, %c0_13] : memref<64x256xbf16, #tpu.memory_space<vmem>>, vector<64x256xbf16>
      tpu.vector_store %arg5[%c0_12, %c0_13], %13 {strides = array<i32>} : memref<64x256xbf16, #tpu.memory_space<vmem>>, vector<64x256xbf16>,
      %cst_14 = arith.constant dense<0.000000e+00> : vector<256xf32>
      %15 = vector.multi_reduction <add>, %12, %cst_14 [0] : vector<64x256xf32> to vector<256xf32>
      %16 = vector.shape_cast %15 : vector<256xf32> to vector<1x256xf32>
      %17 = arith.mulf %12, %12 : vector<64x256xf32>
      %cst_15 = arith.constant dense<0.000000e+00> : vector<256xf32>
      %18 = vector.multi_reduction <add>, %17, %cst_15 [0] : vector<64x256xf32> to vector<256xf32>
      %19 = vector.shape_cast %18 : vector<256xf32> to vector<1x256xf32>
      %20 = tpu.concatenate %16, %19 in 0 : vector<1x256xf32>, vector<1x256xf32> -> vector<2x256xf32>
      %21 = vector.shape_cast %20 : vector<2x256xf32> to vector<1x2x256xf32>
      %c0_16 = arith.constant 0 : index
      %c0_17 = arith.constant 0 : index
      %c0_18 = arith.constant 0 : index
      %22 = vector.load %arg6[%c0_16, %c0_17, %c0_18] : memref<1x2x256xf32, #tpu.memory_space<vmem>>, vector<1x2x256xf32>
      tpu.vector_store %arg6[%c0_16, %c0_17, %c0_18], %21 {strides = array<i32>} : memref<1x2x256xf32, #tpu.memory_space<vmem>>, vector<1x2x256xf32>,
    } else {
    }
    return
  }
  func.func @transform_0(%arg0: i32, %arg1: i32, %arg2: i32) -> (i32, i32) {
    %c0_i32 = arith.constant 0 : i32
    return %arg0, %arg2 : i32, i32
  }
  func.func @transform_1(%arg0: i32, %arg1: i32, %arg2: i32) -> (i32, i32) {
    %c0_i32 = arith.constant 0 : i32
    return %arg2, %arg1 : i32, i32
  }
  func.func @transform_2(%arg0: i32, %arg1: i32, %arg2: i32) -> (i32, i32) {
    %c0_i32 = arith.constant 0 : i32
    return %arg0, %arg1 : i32, i32
  }
  func.func @transform_3(%arg0: i32, %arg1: i32, %arg2: i32) -> (i32, i32, i32) {
    %c0_i32 = arith.constant 0 : i32
    %c0_i32_0 = arith.constant 0 : i32
    return %arg0, %c0_i32, %arg1 : i32, i32, i32
  }
}

module attributes {stable_mosaic.version = 11 : i64} {
  func.func @_bn_relu_kernel(%arg0: i32, %arg1: memref<64x256xbf16, #tpu.memory_space<vmem>>, %arg2: memref<1x256xf32, #tpu.memory_space<vmem>>, %arg3: memref<1x256xf32, #tpu.memory_space<vmem>>, %arg4: memref<64x256xbf16, #tpu.memory_space<vmem>>) attributes {dimension_semantics = [#tpu.dimension_semantics<parallel>], iteration_bounds = array<i64: 2>, scalar_prefetch = 0 : i64, scratch_operands = 0 : i64, tpu.core_type = #tpu.core_type<tc>, window_params = [{transform_indices = @transform_0, window_bounds = array<i64: 64, 256>}, {pipeline_mode = #tpu.pipeline_mode<synchronous>, transform_indices = @transform_1, window_bounds = array<i64: 1, 256>}, {pipeline_mode = #tpu.pipeline_mode<synchronous>, transform_indices = @transform_2, window_bounds = array<i64: 1, 256>}, {transform_indices = @transform_3, window_bounds = array<i64: 64, 256>}]} {
    %c0 = arith.constant 0 : index
    %c0_0 = arith.constant 0 : index
    %0 = vector.load %arg1[%c0, %c0_0] : memref<64x256xbf16, #tpu.memory_space<vmem>>, vector<64x256xbf16>
    %1 = arith.extf %0 : vector<64x256xbf16> to vector<64x256xf32>
    %c0_1 = arith.constant 0 : index
    %c0_2 = arith.constant 0 : index
    %2 = vector.load %arg2[%c0_1, %c0_2] : memref<1x256xf32, #tpu.memory_space<vmem>>, vector<1x256xf32>
    %3 = vector.broadcast %2 : vector<1x256xf32> to vector<64x256xf32>
    %4 = arith.mulf %1, %3 : vector<64x256xf32>
    %c0_3 = arith.constant 0 : index
    %c0_4 = arith.constant 0 : index
    %5 = vector.load %arg3[%c0_3, %c0_4] : memref<1x256xf32, #tpu.memory_space<vmem>>, vector<1x256xf32>
    %6 = vector.broadcast %5 : vector<1x256xf32> to vector<64x256xf32>
    %7 = arith.addf %4, %6 : vector<64x256xf32>
    %cst = arith.constant 0.000000e+00 : f32
    %8 = vector.broadcast %cst : f32 to vector<64x256xf32>
    %9 = arith.maximumf %7, %8 : vector<64x256xf32>
    %10 = arith.truncf %9 : vector<64x256xf32> to vector<64x256xbf16>
    %c0_5 = arith.constant 0 : index
    %c0_6 = arith.constant 0 : index
    %11 = vector.load %arg4[%c0_5, %c0_6] : memref<64x256xbf16, #tpu.memory_space<vmem>>, vector<64x256xbf16>
    tpu.vector_store %arg4[%c0_5, %c0_6], %10 {strides = array<i32>} : memref<64x256xbf16, #tpu.memory_space<vmem>>, vector<64x256xbf16>,
    return
  }
  func.func @transform_0(%arg0: i32) -> (i32, i32) {
    %c0_i32 = arith.constant 0 : i32
    %c0_i32_0 = arith.constant 0 : i32
    return %arg0, %c0_i32 : i32, i32
  }
  func.func @transform_1(%arg0: i32) -> (i32, i32) {
    %c0_i32 = arith.constant 0 : i32
    %c0_i32_0 = arith.constant 0 : i32
    %c0_i32_1 = arith.constant 0 : i32
    return %c0_i32, %c0_i32_0 : i32, i32
  }
  func.func @transform_2(%arg0: i32) -> (i32, i32) {
    %c0_i32 = arith.constant 0 : i32
    %c0_i32_0 = arith.constant 0 : i32
    %c0_i32_1 = arith.constant 0 : i32
    return %c0_i32, %c0_i32_0 : i32, i32
  }
  func.func @transform_3(%arg0: i32) -> (i32, i32) {
    %c0_i32 = arith.constant 0 : i32
    %c0_i32_0 = arith.constant 0 : i32
    return %arg0, %c0_i32 : i32, i32
  }
}

module attributes {stable_mosaic.version = 11 : i64} {
  func.func @_bn2_add_relu_kernel(%arg0: i32, %arg1: memref<64x256xbf16, #tpu.memory_space<vmem>>, %arg2: memref<64x256xbf16, #tpu.memory_space<vmem>>, %arg3: memref<1x256xf32, #tpu.memory_space<vmem>>, %arg4: memref<1x256xf32, #tpu.memory_space<vmem>>, %arg5: memref<1x256xf32, #tpu.memory_space<vmem>>, %arg6: memref<1x256xf32, #tpu.memory_space<vmem>>, %arg7: memref<64x256xf32, #tpu.memory_space<vmem>>) attributes {dimension_semantics = [#tpu.dimension_semantics<parallel>], iteration_bounds = array<i64: 2>, scalar_prefetch = 0 : i64, scratch_operands = 0 : i64, tpu.core_type = #tpu.core_type<tc>, window_params = [{transform_indices = @transform_0, window_bounds = array<i64: 64, 256>}, {transform_indices = @transform_1, window_bounds = array<i64: 64, 256>}, {pipeline_mode = #tpu.pipeline_mode<synchronous>, transform_indices = @transform_2, window_bounds = array<i64: 1, 256>}, {pipeline_mode = #tpu.pipeline_mode<synchronous>, transform_indices = @transform_3, window_bounds = array<i64: 1, 256>}, {pipeline_mode = #tpu.pipeline_mode<synchronous>, transform_indices = @transform_4, window_bounds = array<i64: 1, 256>}, {pipeline_mode = #tpu.pipeline_mode<synchronous>, transform_indices = @transform_5, window_bounds = array<i64: 1, 256>}, {transform_indices = @transform_6, window_bounds = array<i64: 64, 256>}]} {
    %c0 = arith.constant 0 : index
    %c0_0 = arith.constant 0 : index
    %0 = vector.load %arg1[%c0, %c0_0] : memref<64x256xbf16, #tpu.memory_space<vmem>>, vector<64x256xbf16>
    %1 = arith.extf %0 : vector<64x256xbf16> to vector<64x256xf32>
    %c0_1 = arith.constant 0 : index
    %c0_2 = arith.constant 0 : index
    %2 = vector.load %arg3[%c0_1, %c0_2] : memref<1x256xf32, #tpu.memory_space<vmem>>, vector<1x256xf32>
    %3 = vector.broadcast %2 : vector<1x256xf32> to vector<64x256xf32>
    %4 = arith.mulf %1, %3 : vector<64x256xf32>
    %c0_3 = arith.constant 0 : index
    %c0_4 = arith.constant 0 : index
    %5 = vector.load %arg4[%c0_3, %c0_4] : memref<1x256xf32, #tpu.memory_space<vmem>>, vector<1x256xf32>
    %6 = vector.broadcast %5 : vector<1x256xf32> to vector<64x256xf32>
    %7 = arith.addf %4, %6 : vector<64x256xf32>
    %c0_5 = arith.constant 0 : index
    %c0_6 = arith.constant 0 : index
    %8 = vector.load %arg2[%c0_5, %c0_6] : memref<64x256xbf16, #tpu.memory_space<vmem>>, vector<64x256xbf16>
    %9 = arith.extf %8 : vector<64x256xbf16> to vector<64x256xf32>
    %c0_7 = arith.constant 0 : index
    %c0_8 = arith.constant 0 : index
    %10 = vector.load %arg5[%c0_7, %c0_8] : memref<1x256xf32, #tpu.memory_space<vmem>>, vector<1x256xf32>
    %11 = vector.broadcast %10 : vector<1x256xf32> to vector<64x256xf32>
    %12 = arith.mulf %9, %11 : vector<64x256xf32>
    %13 = arith.addf %7, %12 : vector<64x256xf32>
    %c0_9 = arith.constant 0 : index
    %c0_10 = arith.constant 0 : index
    %14 = vector.load %arg6[%c0_9, %c0_10] : memref<1x256xf32, #tpu.memory_space<vmem>>, vector<1x256xf32>
    %15 = vector.broadcast %14 : vector<1x256xf32> to vector<64x256xf32>
    %16 = arith.addf %13, %15 : vector<64x256xf32>
    %cst = arith.constant 0.000000e+00 : f32
    %17 = vector.broadcast %cst : f32 to vector<64x256xf32>
    %18 = arith.maximumf %16, %17 : vector<64x256xf32>
    %c0_11 = arith.constant 0 : index
    %c0_12 = arith.constant 0 : index
    %19 = vector.load %arg7[%c0_11, %c0_12] : memref<64x256xf32, #tpu.memory_space<vmem>>, vector<64x256xf32>
    tpu.vector_store %arg7[%c0_11, %c0_12], %18 {strides = array<i32>} : memref<64x256xf32, #tpu.memory_space<vmem>>, vector<64x256xf32>,
    return
  }
  func.func @transform_0(%arg0: i32) -> (i32, i32) {
    %c0_i32 = arith.constant 0 : i32
    %c0_i32_0 = arith.constant 0 : i32
    return %arg0, %c0_i32 : i32, i32
  }
  func.func @transform_1(%arg0: i32) -> (i32, i32) {
    %c0_i32 = arith.constant 0 : i32
    %c0_i32_0 = arith.constant 0 : i32
    return %arg0, %c0_i32 : i32, i32
  }
  func.func @transform_2(%arg0: i32) -> (i32, i32) {
    %c0_i32 = arith.constant 0 : i32
    %c0_i32_0 = arith.constant 0 : i32
    %c0_i32_1 = arith.constant 0 : i32
    return %c0_i32, %c0_i32_0 : i32, i32
  }
  func.func @transform_3(%arg0: i32) -> (i32, i32) {
    %c0_i32 = arith.constant 0 : i32
    %c0_i32_0 = arith.constant 0 : i32
    %c0_i32_1 = arith.constant 0 : i32
    return %c0_i32, %c0_i32_0 : i32, i32
  }
  func.func @transform_4(%arg0: i32) -> (i32, i32) {
    %c0_i32 = arith.constant 0 : i32
    %c0_i32_0 = arith.constant 0 : i32
    %c0_i32_1 = arith.constant 0 : i32
    return %c0_i32, %c0_i32_0 : i32, i32
  }
  func.func @transform_5(%arg0: i32) -> (i32, i32) {
    %c0_i32 = arith.constant 0 : i32
    %c0_i32_0 = arith.constant 0 : i32
    %c0_i32_1 = arith.constant 0 : i32
    return %c0_i32, %c0_i32_0 : i32, i32
  }
  func.func @transform_6(%arg0: i32) -> (i32, i32) {
    %c0_i32 = arith.constant 0 : i32
    %c0_i32_0 = arith.constant 0 : i32
    return %arg0, %c0_i32 : i32, i32
  }
}

module attributes {stable_mosaic.version = 11 : i64} {
  func.func @_matmul_stats_kernel(%arg0: i32, %arg1: i32, %arg2: i32, %arg3: memref<64x128xbf16, #tpu.memory_space<vmem>>, %arg4: memref<128x256xbf16, #tpu.memory_space<vmem>>, %arg5: memref<64x256xbf16, #tpu.memory_space<vmem>>, %arg6: memref<1x2x256xf32, #tpu.memory_space<vmem>>, %arg7: memref<64x256xf32, #tpu.memory_space<vmem>>) attributes {dimension_semantics = [#tpu.dimension_semantics<parallel>, #tpu.dimension_semantics<parallel>, #tpu.dimension_semantics<arbitrary>], iteration_bounds = array<i64: 2, 1, 1>, scalar_prefetch = 0 : i64, scratch_operands = 1 : i64, tpu.core_type = #tpu.core_type<tc>, window_params = [{transform_indices = @transform_0, window_bounds = array<i64: 64, 128>}, {transform_indices = @transform_1, window_bounds = array<i64: 128, 256>}, {transform_indices = @transform_2, window_bounds = array<i64: 64, 256>}, {transform_indices = @transform_3, window_bounds = array<i64: 1, 2, 256>}]} {
    %c0_i32 = arith.constant 0 : i32
    %0 = arith.cmpi eq, %arg2, %c0_i32 : i32
    %1 = arith.extui %0 : i1 to i32
    %c0_i32_0 = arith.constant 0 : i32
    %2 = arith.cmpi ne, %1, %c0_i32_0 : i32
    scf.if %2 {
      %cst_10 = arith.constant 0.000000e+00 : f32
      %12 = vector.broadcast %cst_10 : f32 to vector<64x256xf32>
      %c0_11 = arith.constant 0 : index
      %c0_12 = arith.constant 0 : index
      %13 = vector.load %arg7[%c0_11, %c0_12] : memref<64x256xf32, #tpu.memory_space<vmem>>, vector<64x256xf32>
      tpu.vector_store %arg7[%c0_11, %c0_12], %12 {strides = array<i32>} : memref<64x256xf32, #tpu.memory_space<vmem>>, vector<64x256xf32>,
    } else {
    }
    %c0 = arith.constant 0 : index
    %c0_1 = arith.constant 0 : index
    %3 = vector.load %arg7[%c0, %c0_1] : memref<64x256xf32, #tpu.memory_space<vmem>>, vector<64x256xf32>
    %c0_2 = arith.constant 0 : index
    %c0_3 = arith.constant 0 : index
    %4 = vector.load %arg3[%c0_2, %c0_3] : memref<64x128xbf16, #tpu.memory_space<vmem>>, vector<64x128xbf16>
    %c0_4 = arith.constant 0 : index
    %c0_5 = arith.constant 0 : index
    %5 = vector.load %arg4[%c0_4, %c0_5] : memref<128x256xbf16, #tpu.memory_space<vmem>>, vector<128x256xbf16>
    %cst = arith.constant dense<0.000000e+00> : vector<64x256xf32>
    %6 = tpu.matmul %4, %5, %cst {dimension_numbers = #tpu.dot_dimension_numbers<[1], [0], [0], [1], [0, 0, 1, 1], [], []>} : vector<64x128xbf16>, vector<128x256xbf16>, vector<64x256xf32> -> vector<64x256xf32>
    %7 = arith.addf %3, %6 : vector<64x256xf32>
    %c0_6 = arith.constant 0 : index
    %c0_7 = arith.constant 0 : index
    %8 = vector.load %arg7[%c0_6, %c0_7] : memref<64x256xf32, #tpu.memory_space<vmem>>, vector<64x256xf32>
    tpu.vector_store %arg7[%c0_6, %c0_7], %7 {strides = array<i32>} : memref<64x256xf32, #tpu.memory_space<vmem>>, vector<64x256xf32>,
    %c0_i32_8 = arith.constant 0 : i32
    %9 = arith.cmpi eq, %arg2, %c0_i32_8 : i32
    %10 = arith.extui %9 : i1 to i32
    %c0_i32_9 = arith.constant 0 : i32
    %11 = arith.cmpi ne, %10, %c0_i32_9 : i32
    scf.if %11 {
      %c0_10 = arith.constant 0 : index
      %c0_11 = arith.constant 0 : index
      %12 = vector.load %arg7[%c0_10, %c0_11] : memref<64x256xf32, #tpu.memory_space<vmem>>, vector<64x256xf32>
      %13 = arith.truncf %12 : vector<64x256xf32> to vector<64x256xbf16>
      %c0_12 = arith.constant 0 : index
      %c0_13 = arith.constant 0 : index
      %14 = vector.load %arg5[%c0_12, %c0_13] : memref<64x256xbf16, #tpu.memory_space<vmem>>, vector<64x256xbf16>
      tpu.vector_store %arg5[%c0_12, %c0_13], %13 {strides = array<i32>} : memref<64x256xbf16, #tpu.memory_space<vmem>>, vector<64x256xbf16>,
      %cst_14 = arith.constant dense<0.000000e+00> : vector<256xf32>
      %15 = vector.multi_reduction <add>, %12, %cst_14 [0] : vector<64x256xf32> to vector<256xf32>
      %16 = vector.shape_cast %15 : vector<256xf32> to vector<1x256xf32>
      %17 = arith.mulf %12, %12 : vector<64x256xf32>
      %cst_15 = arith.constant dense<0.000000e+00> : vector<256xf32>
      %18 = vector.multi_reduction <add>, %17, %cst_15 [0] : vector<64x256xf32> to vector<256xf32>
      %19 = vector.shape_cast %18 : vector<256xf32> to vector<1x256xf32>
      %20 = tpu.concatenate %16, %19 in 0 : vector<1x256xf32>, vector<1x256xf32> -> vector<2x256xf32>
      %21 = vector.shape_cast %20 : vector<2x256xf32> to vector<1x2x256xf32>
      %c0_16 = arith.constant 0 : index
      %c0_17 = arith.constant 0 : index
      %c0_18 = arith.constant 0 : index
      %22 = vector.load %arg6[%c0_16, %c0_17, %c0_18] : memref<1x2x256xf32, #tpu.memory_space<vmem>>, vector<1x2x256xf32>
      tpu.vector_store %arg6[%c0_16, %c0_17, %c0_18], %21 {strides = array<i32>} : memref<1x2x256xf32, #tpu.memory_space<vmem>>, vector<1x2x256xf32>,
    } else {
    }
    return
  }
  func.func @transform_0(%arg0: i32, %arg1: i32, %arg2: i32) -> (i32, i32) {
    %c0_i32 = arith.constant 0 : i32
    return %arg0, %arg2 : i32, i32
  }
  func.func @transform_1(%arg0: i32, %arg1: i32, %arg2: i32) -> (i32, i32) {
    %c0_i32 = arith.constant 0 : i32
    return %arg2, %arg1 : i32, i32
  }
  func.func @transform_2(%arg0: i32, %arg1: i32, %arg2: i32) -> (i32, i32) {
    %c0_i32 = arith.constant 0 : i32
    return %arg0, %arg1 : i32, i32
  }
  func.func @transform_3(%arg0: i32, %arg1: i32, %arg2: i32) -> (i32, i32, i32) {
    %c0_i32 = arith.constant 0 : i32
    %c0_i32_0 = arith.constant 0 : i32
    return %arg0, %c0_i32, %arg1 : i32, i32, i32
  }
}

</mosaic_0001>

<bundles_post_ra>
// kernel: basic_block_forward.6
= control target key start
LH: loop header
LB: loop body
LE: loop exit
PB: predicated region body
PF: predicated region fallthrough
CT: control target
= control target key end

     0   :  { %s388_s12 = smov 0   ;;  %s478_s0 = inlined_call_operand.vmem [shape: bf16[128,256], index: 0, kind: input, shape index: {}]   ;;  %s479_s1 = inlined_call_operand.vmem [shape: f32[1,256], index: 1, kind: input, shape index: {}]   ;;  %s480_s2 = inlined_call_operand.vmem [shape: f32[1,256], index: 2, kind: input, shape index: {}]   ;;  %s481_s3 = inlined_call_operand.vmem [shape: bf16[128,256], index: 3, kind: output, shape index: {}]  }
   0x1 LB: > { %s337_s13 = sadd.s32 4294967295, %s366_s12   ;;  %p341_p0 = scmp.ge.s32.totalorder %s366_s12, 1  ;;  %s366_s12 = sphi %s388_s12, %s13_s12  }
   0x2   : > { %p139_p1 = scmp.lt.s32.totalorder %s366_s12, 3 }
   0x4   : > { %p140_p2 = pnand %p341_p0, %p139_p1 }
   0x5   : > { %s342_s14 = sshll.u32 (!%p140_p2), %s337_s13, 3 }
   0x6   : > { %143 = sbr.rel (%p140_p2) target bundleno = 37 (0x25), region = 32  ;;  %p166_p3 = scmp.lt.s32.totalorder (!%p140_p2), %s342_s14, 15 }
   0xb   : > { %s483_s14 = smov (!%p166_p3, %s342_s14), 15  ;;  %v203_v0 = vld [vmem:[%s479_s1] sm:$0x3] }
   0xc   : > { %v225_v1 = vld [vmem:[%s480_s2] sm:$0x3]  ;;  %s350_s19 = sshll.u32 %s483_s14, 3  ;;  %v412_v2 = vperm.slane %v203_v0, 0  ;;  %v414_v3 = vperm.slane %v203_v0, 1 }
   0xd   : > { %s410_s22 = scalar_lea.vmem %s478_s0, %s350_s19  ;;  %v417_v5 = vperm.slane %v225_v1, 0  ;;  %v419_v6 = vperm.slane %v225_v1, 1  ;;  %s447_s25 = scalar_lea.vmem %s481_s3, %s350_s19 }
   0xe   : > { %v179_v4 = vld [vmem:[%s410_s22] sm:$0xff]  ;;  %v180_v7 = vld [vmem:[%s410_s22 + $0x8] sm:$0xff]  ;;  %v181_v8 = vld [vmem:[%s410_s22 + $0x10] sm:$0xff] }
   0xf   : > { %v187_v9 = vunpack.c.l.bf16 %v179_v4  ;;  %v188_v10 = vunpack.c.h.bf16 %v179_v4  ;;  %v189_v11 = vunpack.c.l.bf16 %v180_v7  ;;  %v190_v12 = vunpack.c.h.bf16 %v180_v7  ;;  %v182_v13 = vld [vmem:[%s410_s22 + $0x18] sm:$0xff]  ;;  %v183_v34 = vld [vmem:[%s410_s22 + $0x20] sm:$0xff]  ;;  %v184_v39 = vld [vmem:[%s410_s22 + $0x28] sm:$0xff] }
  0x10   : > { %v191_v14 = vunpack.c.l.bf16 %v181_v8  ;;  %v192_v15 = vunpack.c.h.bf16 %v181_v8  ;;  %v193_v16 = vunpack.c.l.bf16 %v182_v13  ;;  %v194_v17 = vunpack.c.h.bf16 %v182_v13  ;;  %v185_v44 = vld [vmem:[%s410_s22 + $0x30] sm:$0xff]  ;;  %v186_v49 = vld [vmem:[%s410_s22 + $0x38] sm:$0xff] }
  0x11   : > { %v209_v18 = vmul.f32 %v412_v2, %v187_v9  ;;  %v210_v19 = vmul.f32 %v414_v3, %v188_v10  ;;  %v211_v20 = vmul.f32 %v412_v2, %v189_v11  ;;  %v212_v21 = vmul.f32 %v414_v3, %v190_v12 }
  0x12   : > { %v213_v22 = vmul.f32 %v412_v2, %v191_v14  ;;  %v214_v23 = vmul.f32 %v414_v3, %v192_v15  ;;  %v215_v24 = vmul.f32 %v412_v2, %v193_v16  ;;  %v216_v25 = vmul.f32 %v414_v3, %v194_v17 }
  0x13   : > { %v231_v26 = vadd.f32 %v417_v5, %v209_v18  ;;  %v232_v27 = vadd.f32 %v419_v6, %v210_v19  ;;  %v233_v28 = vadd.f32 %v417_v5, %v211_v20  ;;  %v234_v29 = vadd.f32 %v419_v6, %v212_v21 }
  0x14   : > { %v235_v30 = vadd.f32 %v417_v5, %v213_v22  ;;  %v236_v31 = vadd.f32 %v419_v6, %v214_v23  ;;  %v237_v32 = vadd.f32 %v417_v5, %v215_v24  ;;  %v238_v33 = vadd.f32 %v419_v6, %v216_v25 }
  0x15   : > { %v247_v35 = vmax.f32 %v231_v26, 0.0  ;;  %v248_v36 = vmax.f32 %v232_v27, 0.0  ;;  %v249_v37 = vmax.f32 %v233_v28, 0.0  ;;  %v250_v38 = vmax.f32 %v234_v29, 0.0 }
  0x16   : > { %v251_v40 = vmax.f32 %v235_v30, 0.0  ;;  %v252_v41 = vmax.f32 %v236_v31, 0.0  ;;  %v253_v42 = vmax.f32 %v237_v32, 0.0  ;;  %v254_v43 = vmax.f32 %v238_v33, 0.0 }
  0x17   : > { %v263_v45 = vpack.c.bf16 %v248_v36, %v247_v35  ;;  %v264_v46 = vpack.c.bf16 %v250_v38, %v249_v37  ;;  %v195_v47 = vunpack.c.l.bf16 %v183_v34  ;;  %v196_v48 = vunpack.c.h.bf16 %v183_v34 }
  0x18   : > { %v265_v50 = vpack.c.bf16 %v252_v41, %v251_v40  ;;  %v266_v51 = vpack.c.bf16 %v254_v43, %v253_v42  ;;  %v197_v52 = vunpack.c.l.bf16 %v184_v39  ;;  %v198_v53 = vunpack.c.h.bf16 %v184_v39 }
  0x19   : > { %271 = vst [vmem:[%s447_s25] sm:$0xff] %v263_v45  ;;  %v217_v54 = vmul.f32 %v412_v2, %v195_v47  ;;  %v218_v55 = vmul.f32 %v414_v3, %v196_v48  ;;  %v199_v56 = vunpack.c.l.bf16 %v185_v44  ;;  %v200_v57 = vunpack.c.h.bf16 %v185_v44 }
  0x1a   : > { %272 = vst [vmem:[%s447_s25 + $0x8] sm:$0xff] %v264_v46  ;;  %v219_v58 = vmul.f32 %v412_v2, %v197_v52  ;;  %v220_v59 = vmul.f32 %v414_v3, %v198_v53  ;;  %v201_v60 = vunpack.c.l.bf16 %v186_v49  ;;  %v202_v61 = vunpack.c.h.bf16 %v186_v49 }
  0x1b   : > { %273 = vst [vmem:[%s447_s25 + $0x10] sm:$0xff] %v265_v50  ;;  %v239_v62 = vadd.f32 %v417_v5, %v217_v54  ;;  %v240_v63 = vadd.f32 %v419_v6, %v218_v55  ;;  %v221_v0 = vmul.f32 %v412_v2, %v199_v56  ;;  %v222_v1 = vmul.f32 %v414_v3, %v200_v57 }
  0x1c   : > { %274 = vst [vmem:[%s447_s25 + $0x18] sm:$0xff] %v266_v51  ;;  %v241_v4 = vadd.f32 %v417_v5, %v219_v58  ;;  %v242_v7 = vadd.f32 %v419_v6, %v220_v59  ;;  %v223_v8 = vmul.f32 %v412_v2, %v201_v60  ;;  %v224_v9 = vmul.f32 %v414_v3, %v202_v61 }
  0x1d   : > { %v255_v10 = vmax.f32 %v239_v62, 0.0  ;;  %v256_v11 = vmax.f32 %v240_v63, 0.0  ;;  %v243_v12 = vadd.f32 %v417_v5, %v221_v0  ;;  %v244_v13 = vadd.f32 %v419_v6, %v222_v1 }
  0x1e   : > { %v257_v14 = vmax.f32 %v241_v4, 0.0  ;;  %v258_v15 = vmax.f32 %v242_v7, 0.0  ;;  %v245_v16 = vadd.f32 %v417_v5, %v223_v8  ;;  %v246_v17 = vadd.f32 %v419_v6, %v224_v9 }
  0x1f   : > { %v267_v18 = vpack.c.bf16 %v256_v11, %v255_v10  ;;  %v259_v2 = vmax.f32 %v243_v12, 0.0  ;;  %v260_v19 = vmax.f32 %v244_v13, 0.0 }
  0x20   : > { %v268_v20 = vpack.c.bf16 %v258_v15, %v257_v14  ;;  %v261_v3 = vmax.f32 %v245_v16, 0.0  ;;  %v262_v21 = vmax.f32 %v246_v17, 0.0 }
  0x21   : > { %275 = vst [vmem:[%s447_s25 + $0x20] sm:$0xff] %v267_v18  ;;  %v269_v22 = vpack.c.bf16 %v260_v19, %v259_v2 }
  0x22   : > { %276 = vst [vmem:[%s447_s25 + $0x28] sm:$0xff] %v268_v20  ;;  %v270_v23 = vpack.c.bf16 %v262_v21, %v261_v3 }
  0x23   : > { %277 = vst [vmem:[%s447_s25 + $0x30] sm:$0xff] %v269_v22 }
  0x24   : > { %278 = vst [vmem:[%s447_s25 + $0x38] sm:$0xff] %v270_v23 }
  0x25 PF: > { %s13_s12 = sadd.s32 1, %s366_s12  }
  0x26   : > { %p10_p4 = scmp.ge.s32.totalorder %s13_s12, 4  }
  0x28   :  { %12 = sbr.rel (!%p10_p4) target bundleno = 1 (0x1), region = 62 }

// kernel: basic_block_forward.5
= control target key start
LH: loop header
LB: loop body
LE: loop exit
PB: predicated region body
PF: predicated region fallthrough
CT: control target
= control target key end

     0   :  { %s1278_s12 = smov 0   ;;  %s1280_s13 = smov 0   ;;  %s1546_s0 = inlined_call_operand.vmem [shape: bf16[128,256], index: 0, kind: input, shape index: {}]   ;;  %s1547_s1 = inlined_call_operand.vmem [shape: bf16[256,256], index: 1, kind: input, shape index: {}]   ;;  %s1548_s2 = inlined_call_operand.vmem [shape: bf16[128,256], index: 2, kind: output, shape index: {0}]   ;;  %s1549_s3 = inlined_call_operand.vmem [shape: f32[2,2,256], index: 3, kind: output, shape index: {1}]  }
   0x1   :  { %s1282_s14 = smov 0  }
   0x2 LB: > { %s33_s15 = sadd.s32 1, %s1252_s13  ;;  %p996_p0 = scmp.ge.s32.totalorder %s1256_s14, 1  ;;  %s1256_s14 = sphi %s1282_s14, %s14_s14   ;;  %s1252_s13 = sphi %s1280_s13, %s1551_s13   ;;  %s1248_s12 = sphi %s1278_s12, %s1550_s12  }
   0x3   : > { %p35_p1 = scmp.ge.s32.totalorder %s33_s15, 2  ;;  %p191_p2 = scmp.lt.s32.totalorder %s1256_s14, 3 }
   0x5   : > { %s1553_s15 = smov (%p35_p1, %s33_s15), 0  ;;  %p192_p3 = pnand %p996_p0, %p191_p2 }
   0x6   : > { %s997_s5 = sshll.u32 (!%p192_p3), %s1248_s12, 3  ;;  %p281_p5 = scmp.lt.s32.totalorder (!%p192_p3), %s1248_s12, 1 }
   0x7   : > { %195 = sbr.rel (%p192_p3) target bundleno = 259 (0x103), region = 28  ;;  %p246_p4 = scmp.lt.s32.totalorder (!%p192_p3), %s997_s5, 15 }
   0xc   : > { %v1095_v0 = vld [vmem:[%s1547_s1 + $0x70] sm:$0xf]  ;;  %v1193_v1 = vld [vmem:[%s1547_s1 + $0x74] sm:$0xf0]  ;;  %v1192_v5 = vld [vmem:[%s1547_s1 + $0x74] sm:$0xf] }
   0xd   : > { %v1159_v2 = vld [vmem:[%s1547_s1 + $0xf0] sm:$0xf]  ;;  %v1096_v3 = vor.u32 %v1193_v1, %v1095_v0  ;;  %v1209_v4 = vld [vmem:[%s1547_s1 + $0xf4] sm:$0xf0]  ;;  %v1097_v6 = vld [vmem:[%s1547_s1 + $0x78] sm:$0xf0] }
   0xe   : > { %v1160_v7 = vor.u32 %v1209_v4, %v1159_v2  ;;  %v1100_v8 = vor.u32 %v1192_v5, %v1097_v6  ;;  %v1208_v9 = vld [vmem:[%s1547_s1 + $0xf4] sm:$0xf]  ;;  %v1161_v10 = vld [vmem:[%s1547_s1 + $0xf8] sm:$0xf0]  ;;  %v1087_v11 = vld [vmem:[%s1547_s1 + $0x60] sm:$0xf] }
   0xf   : > { %566 = vmatpush.bf16.msra.mxu0 %v1096_v3  ;;  %v1164_v12 = vor.u32 %v1208_v9, %v1161_v10  ;;  %v1191_v13 = vld [vmem:[%s1547_s1 + $0x64] sm:$0xf0]  ;;  %v1151_v14 = vld [vmem:[%s1547_s1 + $0xe0] sm:$0xf]  ;;  %v1190_v18 = vld [vmem:[%s1547_s1 + $0x64] sm:$0xf] }
  0x10   : > { %v1207_v15 = vld [vmem:[%s1547_s1 + $0xe4] sm:$0xf0]  ;;  %595 = vmatpush.bf16.msra.mxu1 %v1160_v7  ;;  %624 = vmatpush.bf16.msra.mxu2 %v1100_v8  ;;  %v1088_v16 = vor.u32 %v1191_v13, %v1087_v11  ;;  %v1089_v19 = vld [vmem:[%s1547_s1 + $0x68] sm:$0xf0]  ;;  %v1206_v20 = vld [vmem:[%s1547_s1 + $0xe4] sm:$0xf] }
  0x11   : > { %v1152_v17 = vor.u32 %v1207_v15, %v1151_v14  ;;  %653 = vmatpush.bf16.msra.mxu3 %v1164_v12  ;;  %v1092_v21 = vor.u32 %v1190_v18, %v1089_v19  ;;  %v1153_v22 = vld [vmem:[%s1547_s1 + $0xe8] sm:$0xf0]  ;;  %v1079_v23 = vld [vmem:[%s1547_s1 + $0x50] sm:$0xf]  ;;  %v1189_v24 = vld [vmem:[%s1547_s1 + $0x54] sm:$0xf0] }
  0x12   : > { %v1156_v25 = vor.u32 %v1206_v20, %v1153_v22  ;;  %v1143_v26 = vld [vmem:[%s1547_s1 + $0xd0] sm:$0xf]  ;;  %v1205_v27 = vld [vmem:[%s1547_s1 + $0xd4] sm:$0xf0]  ;;  %v1188_v28 = vld [vmem:[%s1547_s1 + $0x54] sm:$0xf]  ;;  %v1080_v29 = vor.u32 %v1189_v24, %v1079_v23 }
  0x13   : > { %567 = vmatpush.bf16.msra.mxu0 %v1088_v16  ;;  %v1081_v30 = vld [vmem:[%s1547_s1 + $0x58] sm:$0xf0]  ;;  %v1204_v31 = vld [vmem:[%s1547_s1 + $0xd4] sm:$0xf]  ;;  %v1144_v33 = vor.u32 %v1205_v27, %v1143_v26  ;;  %v1071_v35 = vld [vmem:[%s1547_s1 + $0x40] sm:$0xf] }
  0x14   : > { %v1145_v32 = vld [vmem:[%s1547_s1 + $0xd8] sm:$0xf0]  ;;  %596 = vmatpush.bf16.msra.mxu1 %v1152_v17  ;;  %625 = vmatpush.bf16.msra.mxu2 %v1092_v21  ;;  %v1084_v34 = vor.u32 %v1188_v28, %v1081_v30  ;;  %v1187_v36 = vld [vmem:[%s1547_s1 + $0x44] sm:$0xf0]  ;;  %v1135_v37 = vld [vmem:[%s1547_s1 + $0xc0] sm:$0xf] }
  0x15   : > { %654 = vmatpush.bf16.msra.mxu3 %v1156_v25  ;;  %v1148_v38 = vor.u32 %v1204_v31, %v1145_v32  ;;  %v1203_v39 = vld [vmem:[%s1547_s1 + $0xc4] sm:$0xf0]  ;;  %v1186_v40 = vld [vmem:[%s1547_s1 + $0x44] sm:$0xf]  ;;  %v1073_v41 = vld [vmem:[%s1547_s1 + $0x48] sm:$0xf0]  ;;  %v1072_v44 = vor.u32 %v1187_v36, %v1071_v35 }
  0x16   : > { %v1202_v42 = vld [vmem:[%s1547_s1 + $0xc4] sm:$0xf]  ;;  %v1137_v43 = vld [vmem:[%s1547_s1 + $0xc8] sm:$0xf0]  ;;  %v1136_v45 = vor.u32 %v1203_v39, %v1135_v37  ;;  %v1076_v46 = vor.u32 %v1186_v40, %v1073_v41  ;;  %v1063_v47 = vld [vmem:[%s1547_s1 + $0x30] sm:$0xf] }
  0x17   : > { %568 = vmatpush.bf16.msra.mxu0 %v1080_v29  ;;  %v1185_v48 = vld [vmem:[%s1547_s1 + $0x34] sm:$0xf0]  ;;  %v1127_v49 = vld [vmem:[%s1547_s1 + $0xb0] sm:$0xf]  ;;  %v1140_v50 = vor.u32 %v1202_v42, %v1137_v43  ;;  %v1184_v52 = vld [vmem:[%s1547_s1 + $0x34] sm:$0xf] }
  0x18   : > { %597 = vmatpush.bf16.msra.mxu1 %v1144_v33  ;;  %626 = vmatpush.bf16.msra.mxu2 %v1084_v34  ;;  %v1201_v51 = vld [vmem:[%s1547_s1 + $0xb4] sm:$0xf0]  ;;  %v1065_v53 = vld [vmem:[%s1547_s1 + $0x38] sm:$0xf0]  ;;  %v1200_v54 = vld [vmem:[%s1547_s1 + $0xb4] sm:$0xf]  ;;  %v1064_v56 = vor.u32 %v1185_v48, %v1063_v47 }
  0x19   : > { %655 = vmatpush.bf16.msra.mxu3 %v1148_v38  ;;  %v1129_v55 = vld [vmem:[%s1547_s1 + $0xb8] sm:$0xf0]  ;;  %v1128_v57 = vor.u32 %v1201_v51, %v1127_v49  ;;  %v1068_v58 = vor.u32 %v1184_v52, %v1065_v53  ;;  %v1055_v59 = vld [vmem:[%s1547_s1 + $0x20] sm:$0xf]  ;;  %v1183_v60 = vld [vmem:[%s1547_s1 + $0x24] sm:$0xf0] }
  0x1a   : > { %v1119_v61 = vld [vmem:[%s1547_s1 + $0xa0] sm:$0xf]  ;;  %v1132_v62 = vor.u32 %v1200_v54, %v1129_v55  ;;  %v1199_v63 = vld [vmem:[%s1547_s1 + $0xa4] sm:$0xf0]  ;;  %v1182_v0 = vld [vmem:[%s1547_s1 + $0x24] sm:$0xf]  ;;  %v1056_v4 = vor.u32 %v1183_v60, %v1055_v59 }
  0x1b   : > { %569 = vmatpush.bf16.msra.mxu0 %v1072_v44  ;;  %v1057_v1 = vld [vmem:[%s1547_s1 + $0x28] sm:$0xf0]  ;;  %v1198_v2 = vld [vmem:[%s1547_s1 + $0xa4] sm:$0xf]  ;;  %v1047_v5 = vld [vmem:[%s1547_s1 + $0x10] sm:$0xf]  ;;  %v1120_v6 = vor.u32 %v1199_v63, %v1119_v61 }
  0x1c   : > { %598 = vmatpush.bf16.msra.mxu1 %v1136_v45  ;;  %627 = vmatpush.bf16.msra.mxu2 %v1076_v46  ;;  %v1121_v3 = vld [vmem:[%s1547_s1 + $0xa8] sm:$0xf0]  ;;  %v1060_v7 = vor.u32 %v1182_v0, %v1057_v1  ;;  %v1181_v8 = vld [vmem:[%s1547_s1 + $0x14] sm:$0xf0]  ;;  %v1111_v9 = vld [vmem:[%s1547_s1 + $0x90] sm:$0xf] }
  0x1d   : > { %656 = vmatpush.bf16.msra.mxu3 %v1140_v50  ;;  %v1197_v10 = vld [vmem:[%s1547_s1 + $0x94] sm:$0xf0]  ;;  %v1124_v11 = vor.u32 %v1198_v2, %v1121_v3  ;;  %v1180_v12 = vld [vmem:[%s1547_s1 + $0x14] sm:$0xf]  ;;  %v1049_v13 = vld [vmem:[%s1547_s1 + $0x18] sm:$0xf0]  ;;  %v1048_v16 = vor.u32 %v1181_v8, %v1047_v5 }
  0x1e   : > { %v1196_v14 = vld [vmem:[%s1547_s1 + $0x94] sm:$0xf]  ;;  %v1113_v15 = vld [vmem:[%s1547_s1 + $0x98] sm:$0xf0]  ;;  %v1039_v17 = vld [vmem:[%s1547_s1] sm:$0xf]  ;;  %v1112_v18 = vor.u32 %v1197_v10, %v1111_v9  ;;  %v1052_v19 = vor.u32 %v1180_v12, %v1049_v13 }
  0x1f   : > { %570 = vmatpush.bf16.msra.mxu0 %v1064_v56  ;;  %v1179_v20 = vld [vmem:[%s1547_s1 + $0x4] sm:$0xf0]  ;;  %v1103_v21 = vld [vmem:[%s1547_s1 + $0x80] sm:$0xf]  ;;  %s1555_s5 = smov (!%p246_p4, %s997_s5), 15  ;;  %v1116_v22 = vor.u32 %v1196_v14, %v1113_v15  ;;  %s1557_s12 = smov (!%p281_p5, %s1248_s12), 1 }
  0x20   : > { %599 = vmatpush.bf16.msra.mxu1 %v1128_v57  ;;  %628 = vmatpush.bf16.msra.mxu2 %v1068_v58  ;;  %v1195_v23 = vld [vmem:[%s1547_s1 + $0x84] sm:$0xf0]  ;;  %v1178_v24 = vld [vmem:[%s1547_s1 + $0x4] sm:$0xf]  ;;  %v1041_v25 = vld [vmem:[%s1547_s1 + $0x8] sm:$0xf0]  ;;  %v1040_v28 = vor.u32 %v1179_v20, %v1039_v17 }
  0x21   : > { %657 = vmatpush.bf16.msra.mxu3 %v1132_v62  ;;  %v1194_v26 = vld [vmem:[%s1547_s1 + $0x84] sm:$0xf]  ;;  %v1105_v27 = vld [vmem:[%s1547_s1 + $0x88] sm:$0xf0]  ;;  %s1167_s30 = sshll.u32 %s1555_s5, 3  ;;  %v1104_v29 = vor.u32 %v1195_v23, %v1103_v21  ;;  %v1044_v30 = vor.u32 %v1178_v24, %v1041_v25  ;;  %s1169_s5 = sshll.u32 %s1557_s12, 2 }
  0x22   : > { %s1499_s7 = scalar_lea.vmem %s1546_s0, %s1167_s30  ;;  %v1108_v34 = vor.u32 %v1194_v26, %v1105_v27  ;;  %s1522_s10 = scalar_lea.vmem %s1548_s2, %s1167_s30  ;;  %vm817_vm0 = vcmask 1040384   ;;  %vm823_vm1 = vcmask 1041408  }
  0x23   : > { %571 = vmatpush.bf16.msra.mxu0 %v1056_v4  ;;  %v1007_v31 = vld [vmem:[%s1499_s7] sm:$0xf]  ;;  %v1171_v32 = vld [vmem:[%s1499_s7 + $0x4] sm:$0xf0]  ;;  %v1170_v33 = vld [vmem:[%s1499_s7 + $0x4] sm:$0xf]  ;;  %s288_s17 = scalar_lea.vmem %s1549_s3, %s1169_s5 }
  0x24   : > { %600 = vmatpush.bf16.msra.mxu1 %v1120_v6  ;;  %629 = vmatpush.bf16.msra.mxu2 %v1060_v7  ;;  %v1009_v35 = vld [vmem:[%s1499_s7 + $0x8] sm:$0xf0]  ;;  %v1008_v36 = vor.u32 %v1171_v32, %v1007_v31  ;;  %v1015_v38 = vld [vmem:[%s1499_s7 + $0x10] sm:$0xf]  ;;  %v1173_v39 = vld [vmem:[%s1499_s7 + $0x14] sm:$0xf0] }
  0x25   : > { %658 = vmatpush.bf16.msra.mxu3 %v1124_v11  ;;  %v1012_v37 = vor.u32 %v1170_v33, %v1009_v35  ;;  %v1172_v40 = vld [vmem:[%s1499_s7 + $0x14] sm:$0xf]  ;;  %v1017_v41 = vld [vmem:[%s1499_s7 + $0x18] sm:$0xf0]  ;;  %v1016_v42 = vor.u32 %v1173_v39, %v1015_v38  ;;  %v1023_v44 = vld [vmem:[%s1499_s7 + $0x20] sm:$0xf] }
  0x26   : > { %v1020_v43 = vor.u32 %v1172_v40, %v1017_v41  ;;  %v1175_v45 = vld [vmem:[%s1499_s7 + $0x24] sm:$0xf0]  ;;  %v1174_v46 = vld [vmem:[%s1499_s7 + $0x24] sm:$0xf]  ;;  %v1025_v47 = vld [vmem:[%s1499_s7 + $0x28] sm:$0xf0] }
  0x27   : > { %572 = vmatpush.bf16.msra.mxu0 %v1048_v16  ;;  %v1024_v48 = vor.u32 %v1175_v45, %v1023_v44  ;;  %v1028_v49 = vor.u32 %v1174_v46, %v1025_v47  ;;  %v1031_v50 = vld [vmem:[%s1499_s7 + $0x30] sm:$0xf]  ;;  %v1177_v51 = vld [vmem:[%s1499_s7 + $0x34] sm:$0xf0]  ;;  %v1176_v52 = vld [vmem:[%s1499_s7 + $0x34] sm:$0xf] }
  0x28   : > { %601 = vmatpush.bf16.msra.mxu1 %v1112_v18  ;;  %630 = vmatpush.bf16.msra.mxu2 %v1052_v19  ;;  %v1033_v53 = vld [vmem:[%s1499_s7 + $0x38] sm:$0xf0]  ;;  %v1032_v54 = vor.u32 %v1177_v51, %v1031_v50 }
  0x29   : > { %659 = vmatpush.bf16.msra.mxu3 %v1116_v22  ;;  %v1036_v55 = vor.u32 %v1176_v52, %v1033_v53 }
  0x2b   : > { %573 = vmatpush.bf16.msra.mxu0 %v1040_v28 }
  0x2c   : > { %602 = vmatpush.bf16.msra.mxu1 %v1104_v29  ;;  %631 = vmatpush.bf16.msra.mxu2 %v1044_v30 }
  0x2d   : > { %660 = vmatpush.bf16.msra.mxu3 %v1108_v34 }
  0x2e   : > { %574 = vmatmul.bf16.vlgmr.msra.gmra.mxu0 %v1008_v36 }
  0x2f   : > { %603 = vmatmul.bf16.vlgmr.msra.gmra.mxu1 %v1012_v37  ;;  %632 = vmatmul.bf16.vlgmr.msra.gmra.mxu2 %v1008_v36 }
  0x30   : > { %661 = vmatmul.bf16.vlgmr.msra.gmra.mxu3 %v1012_v37 }
  0x3e   : > { %579 = vmatmul.bf16.gmra.mxu0 %v1016_v42 }
  0x3f   : > { %608 = vmatmul.bf16.gmra.mxu1 %v1020_v43  ;;  %637 = vmatmul.bf16.gmra.mxu2 %v1016_v42 }
  0x40   : > { %666 = vmatmul.bf16.gmra.mxu3 %v1020_v43 }
  0x4e   : > { %584 = vmatmul.bf16.gmra.mxu0 %v1024_v48 }
  0x4f   : > { %613 = vmatmul.bf16.gmra.mxu1 %v1028_v49  ;;  %642 = vmatmul.bf16.gmra.mxu2 %v1024_v48 }
  0x50   : > { %671 = vmatmul.bf16.gmra.mxu3 %v1028_v49 }
  0x5e   : > { %589 = vmatmul.bf16.gmra.mxu0 %v1032_v54 }
  0x5f   : > { %618 = vmatmul.bf16.gmra.mxu1 %v1036_v55  ;;  %647 = vmatmul.bf16.gmra.mxu2 %v1032_v54 }
  0x60   : > { %676 = vmatmul.bf16.gmra.mxu3 %v1036_v55 }
  0xab   : > { %v575_v56 = vpop.f32.mrf.mxu0 }
  0xac   : > { %v604_v57 = vpop.f32.mrf.mxu1 }
  0xad   : > { %v605_v58 = vadd.f32 %v604_v57, %v575_v56 }
  0xaf   : > { %v775_v29 = vmul.f32 %v605_v58, %v605_v58 }
  0xb2   : > { %v633_v59 = vpop.f32.mrf.mxu2 }
  0xb3   : > { %v662_v60 = vpop.f32.mrf.mxu3  ;;  %v577_v61 = vpop.f32.mrf.mxu0 }
  0xb4   : > { %v663_v62 = vadd.f32 %v662_v60, %v633_v59  ;;  %v606_v63 = vpop.f32.mrf.mxu1 }
  0xb5   : > { %v607_v4 = vadd.f32 %v606_v63, %v577_v61 }
  0xb6   : > { %v733_v0 = vpack.c.bf16 %v663_v62, %v605_v58  ;;  %v776_v48 = vmul.f32 %v663_v62, %v663_v62 }
  0xb7   : > { %v777_v30 = vmul.f32 %v607_v4, %v607_v4  ;;  %v749_v32 = vadd.f32 %v607_v4, %v605_v58 }
  0xb8   : > { %741 = vst [vmem:[%s1522_s10] sm:$0xff] %v733_v0 }
  0xb9   : > { %v791_v39 = vadd.f32 %v777_v30, %v775_v29 }
  0xba   : > { %v635_v1 = vpop.f32.mrf.mxu2 }
  0xbb   : > { %v664_v2 = vpop.f32.mrf.mxu3  ;;  %v580_v3 = vpop.f32.mrf.mxu0 }
  0xbc   : > { %v665_v5 = vadd.f32 %v664_v2, %v635_v1  ;;  %v609_v6 = vpop.f32.mrf.mxu1 }
  0xbd   : > { %v610_v11 = vadd.f32 %v609_v6, %v580_v3 }
  0xbe   : > { %v734_v7 = vpack.c.bf16 %v665_v5, %v607_v4  ;;  %v778_v42 = vmul.f32 %v665_v5, %v665_v5  ;;  %v762_v53 = vadd.f32 %v665_v5, %v663_v62 }
  0xbf   : > { %v779_v33 = vmul.f32 %v610_v11, %v610_v11  ;;  %v750_v40 = vadd.f32 %v749_v32, %v610_v11 }
  0xc0   : > { %742 = vst [vmem:[%s1522_s10 + $0x8] sm:$0xff] %v734_v7  ;;  %v804_v54 = vadd.f32 %v778_v42, %v776_v48 }
  0xc1   : > { %v792_v44 = vadd.f32 %v791_v39, %v779_v33 }
  0xc2   : > { %v638_v8 = vpop.f32.mrf.mxu2 }
  0xc3   : > { %v667_v9 = vpop.f32.mrf.mxu3  ;;  %v582_v10 = vpop.f32.mrf.mxu0 }
  0xc4   : > { %v668_v12 = vadd.f32 %v667_v9, %v638_v8  ;;  %v611_v13 = vpop.f32.mrf.mxu1 }
  0xc5   : > { %v612_v18 = vadd.f32 %v611_v13, %v582_v10 }
  0xc6   : > { %v735_v14 = vpack.c.bf16 %v668_v12, %v610_v11  ;;  %v780_v49 = vmul.f32 %v668_v12, %v668_v12  ;;  %v763_v63 = vadd.f32 %v762_v53, %v668_v12 }
  0xc7   : > { %v781_v41 = vmul.f32 %v612_v18, %v612_v18  ;;  %v751_v45 = vadd.f32 %v750_v40, %v612_v18 }
  0xc8   : > { %743 = vst [vmem:[%s1522_s10 + $0x10] sm:$0xff] %v735_v14  ;;  %v805_v0 = vadd.f32 %v804_v54, %v780_v49 }
  0xc9   : > { %v793_v50 = vadd.f32 %v792_v44, %v781_v41 }
  0xca   : > { %v640_v15 = vpop.f32.mrf.mxu2 }
  0xcb   : > { %v669_v16 = vpop.f32.mrf.mxu3  ;;  %v585_v17 = vpop.f32.mrf.mxu0 }
  0xcc   : > { %v670_v19 = vadd.f32 %v669_v16, %v640_v15  ;;  %v614_v20 = vpop.f32.mrf.mxu1 }
  0xcd   : > { %v615_v25 = vadd.f32 %v614_v20, %v585_v17 }
  0xce   : > { %v736_v21 = vpack.c.bf16 %v670_v19, %v612_v18  ;;  %v782_v55 = vmul.f32 %v670_v19, %v670_v19  ;;  %v764_v8 = vadd.f32 %v763_v63, %v670_v19 }
  0xcf   : > { %v783_v46 = vmul.f32 %v615_v25, %v615_v25  ;;  %v752_v51 = vadd.f32 %v751_v45, %v615_v25 }
  0xd0   : > { %744 = vst [vmem:[%s1522_s10 + $0x18] sm:$0xff] %v736_v21  ;;  %v806_v9 = vadd.f32 %v805_v0, %v782_v55 }
  0xd1   : > { %v794_v57 = vadd.f32 %v793_v50, %v783_v46 }
  0xd2   : > { %v643_v22 = vpop.f32.mrf.mxu2 }
  0xd3   : > { %v672_v23 = vpop.f32.mrf.mxu3  ;;  %v587_v24 = vpop.f32.mrf.mxu0 }
  0xd4   : > { %v673_v26 = vadd.f32 %v672_v23, %v643_v22  ;;  %v616_v27 = vpop.f32.mrf.mxu1 }
  0xd5   : > { %v617_v36 = vadd.f32 %v616_v27, %v587_v24 }
  0xd6   : > { %v737_v28 = vpack.c.bf16 %v673_v26, %v615_v25  ;;  %v784_v3 = vmul.f32 %v673_v26, %v673_v26  ;;  %v765_v14 = vadd.f32 %v764_v8, %v673_v26 }
  0xd7   : > { %v785_v52 = vmul.f32 %v617_v36, %v617_v36  ;;  %v753_v58 = vadd.f32 %v752_v51, %v617_v36 }
  0xd8   : > { %745 = vst [vmem:[%s1522_s10 + $0x20] sm:$0xff] %v737_v28  ;;  %v807_v15 = vadd.f32 %v806_v9, %v784_v3 }
  0xd9   : > { %v795_v4 = vadd.f32 %v794_v57, %v785_v52 }
  0xda   : > { %v645_v31 = vpop.f32.mrf.mxu2 }
  0xdb   : > { %v674_v34 = vpop.f32.mrf.mxu3  ;;  %v590_v35 = vpop.f32.mrf.mxu0 }
  0xdc   : > { %v675_v37 = vadd.f32 %v674_v34, %v645_v31  ;;  %v619_v38 = vpop.f32.mrf.mxu1 }
  0xdd   : > { %v620_v47 = vadd.f32 %v619_v38, %v590_v35 }
  0xde   : > { %v738_v43 = vpack.c.bf16 %v675_v37, %v617_v36  ;;  %v786_v5 = vmul.f32 %v675_v37, %v675_v37  ;;  %v766_v17 = vadd.f32 %v765_v14, %v675_v37 }
  0xdf   : > { %v787_v59 = vmul.f32 %v620_v47, %v620_v47  ;;  %v754_v6 = vadd.f32 %v753_v58, %v620_v47 }
  0xe0   : > { %746 = vst [vmem:[%s1522_s10 + $0x28] sm:$0xff] %v738_v43  ;;  %v808_v21 = vadd.f32 %v807_v15, %v786_v5 }
  0xe1   : > { %v796_v10 = vadd.f32 %v795_v4, %v787_v59 }
  0xe2   : > { %v648_v56 = vpop.f32.mrf.mxu2 }
  0xe3   : > { %v677_v60 = vpop.f32.mrf.mxu3  ;;  %v592_v61 = vpop.f32.mrf.mxu0 }
  0xe4   : > { %v678_v1 = vadd.f32 %v677_v60, %v648_v56  ;;  %v621_v2 = vpop.f32.mrf.mxu1 }
  0xe5   : > { %v622_v7 = vadd.f32 %v621_v2, %v592_v61 }
  0xe6   : > { %v739_v62 = vpack.c.bf16 %v678_v1, %v620_v47  ;;  %v788_v16 = vmul.f32 %v678_v1, %v678_v1  ;;  %v767_v24 = vadd.f32 %v766_v17, %v678_v1 }
  0xe7   : > { %v755_v11 = vadd.f32 %v754_v6, %v622_v7  ;;  %v789_v13 = vmul.f32 %v622_v7, %v622_v7 }
  0xe8   : > { %747 = vst [vmem:[%s1522_s10 + $0x30] sm:$0xff] %v739_v62  ;;  %v809_v25 = vadd.f32 %v808_v21, %v788_v16 }
  0xe9   : > { %v797_v12 = vadd.f32 %v796_v10, %v789_v13  ;;  %v756_v18 = vrot.slane %v755_v11, 4 }
  0xea   : > { %v650_v20 = vpop.f32.mrf.mxu2 }
  0xeb   : > { %v798_v22 = vrot.slane %v797_v12, 4  ;;  %v679_v23 = vpop.f32.mrf.mxu3  ;;  %v757_v28 = vadd.f32 %v756_v18, %v755_v11 }
  0xec   : > { %v680_v19 = vadd.f32 %v679_v23, %v650_v20 }
  0xed   : > { %v799_v27 = vadd.f32 %v798_v22, %v797_v12  ;;  %v758_v34 = vrot.slane %v757_v28, 2 }
  0xee   : > { %v740_v29 = vpack.c.bf16 %v680_v19, %v622_v7  ;;  %v768_v30 = vadd.f32 %v767_v24, %v680_v19  ;;  %v790_v26 = vmul.f32 %v680_v19, %v680_v19 }
  0xef   : > { %v800_v31 = vrot.slane %v799_v27, 2  ;;  %v759_v40 = vadd.f32 %v758_v34, %v757_v28 }
  0xf0   : > { %748 = vst [vmem:[%s1522_s10 + $0x38] sm:$0xff] %v740_v29  ;;  %v769_v32 = vrot.slane %v768_v30, 4  ;;  %v810_v33 = vadd.f32 %v809_v25, %v790_v26 }
  0xf1   : > { %v801_v37 = vadd.f32 %v800_v31, %v799_v27  ;;  %v760_v46 = vrot.slane %v759_v40, 1 }
  0xf2   : > { %v770_v35 = vadd.f32 %v769_v32, %v768_v30  ;;  %v811_v36 = vrot.slane %v810_v33, 4 }
  0xf3   : > { %v802_v43 = vrot.slane %v801_v37, 1  ;;  %v761_v51 = vadd.f32 %v760_v46, %v759_v40 }
  0xf4   : > { %v771_v38 = vrot.slane %v770_v35, 2  ;;  %v812_v39 = vadd.f32 %v811_v36, %v810_v33 }
  0xf5   : > { %v803_v48 = vadd.f32 %v802_v43, %v801_v37 }
  0xf6   : > { %v772_v41 = vadd.f32 %v771_v38, %v770_v35  ;;  %v813_v42 = vrot.slane %v812_v39, 2 }
  0xf7   : > { %v818_v54 = vsel %vm817_vm0, %v761_v51, %v803_v48 }
  0xf8   : > { %v773_v44 = vrot.slane %v772_v41, 1  ;;  %v814_v45 = vadd.f32 %v813_v42, %v812_v39 }
  0xfa   : > { %v815_v47 = vrot.slane %v814_v45, 1  ;;  %v774_v49 = vadd.f32 %v773_v44, %v772_v41 }
  0xfc   : > { %v816_v50 = vadd.f32 %v815_v47, %v814_v45 }
  0xfe   : > { %v819_v52 = vsel %vm817_vm0, %v774_v49, %v816_v50 }
  0xff   : > { %v822_v53 = vrot.slane %v819_v52, 6 }
 0x101   : > { %v824_v55 = vsel %vm823_vm1, %v818_v54, %v822_v53 }
 0x102   : > { %826 = vst [vmem:[%s288_s17] sm:$0xf] %v824_v55 }
 0x103 PF: > { %s14_s14 = sadd.s32 1, %s1256_s14   ;;  %s1550_s12 = smov %s1252_s13 }
 0x104   : > { %p11_p6 = scmp.ge.s32.totalorder %s14_s14, 4   ;;  %s1551_s13 = smov %s1553_s15 }
 0x106   :  { %13 = sbr.rel (!%p11_p6) target bundleno = 2 (0x2), region = 81 }

// kernel: basic_block_forward.9
= control target key start
LH: loop header
LB: loop body
LE: loop exit
PB: predicated region body
PF: predicated region fallthrough
CT: control target
= control target key end

     0   :  { %s609_s21 = smov 0   ;;  %s763_s0 = inlined_call_operand.vmem [shape: bf16[128,256], index: 0, kind: input, shape index: {}]   ;;  %s764_s1 = inlined_call_operand.vmem [shape: bf16[128,256], index: 1, kind: input, shape index: {}]   ;;  %s765_s2 = inlined_call_operand.vmem [shape: f32[1,256], index: 2, kind: input, shape index: {}]   ;;  %s766_s3 = inlined_call_operand.vmem [shape: f32[1,256], index: 3, kind: input, shape index: {}]   ;;  %s767_s4 = inlined_call_operand.vmem [shape: f32[1,256], index: 4, kind: input, shape index: {}]   ;;  %s768_s5 = inlined_call_operand.vmem [shape: f32[1,256], index: 5, kind: input, shape index: {}]   ;;  %s769_s6 = inlined_call_operand.vmem [shape: f32[128,256], index: 6, kind: output, shape index: {}]  }
   0x1 LB: > { %s539_s22 = sadd.s32 4294967295, %s572_s21   ;;  %p543_p0 = scmp.ge.s32.totalorder %s572_s21, 1  ;;  %s572_s21 = sphi %s609_s21, %s16_s21  }
   0x2   : > { %p226_p1 = scmp.lt.s32.totalorder %s572_s21, 3 }
   0x4   : > { %p227_p2 = pnand %p543_p0, %p226_p1 }
   0x5   : > { %s544_s23 = sshll.u32 (!%p227_p2), %s539_s22, 3 }
   0x6   : > { %230 = sbr.rel (%p227_p2) target bundleno = 55 (0x37), region = 44  ;;  %p265_p3 = scmp.lt.s32.totalorder (!%p227_p2), %s544_s23, 15 }
   0xb   : > { %v309_v0 = vld [vmem:[%s765_s2] sm:$0x3]  ;;  %s771_s23 = smov (!%p265_p3, %s544_s23), 15 }
   0xc   : > { %v331_v1 = vld [vmem:[%s766_s3] sm:$0x3]  ;;  %s555_s8 = sshll.u32 %s771_s23, 3  ;;  %v632_v4 = vperm.slane %v309_v0, 0  ;;  %v648_v7 = vperm.slane %v309_v0, 1  ;;  %s557_s15 = sshll.u32 %s771_s23, 4 }
   0xd   : > { %v377_v2 = vld [vmem:[%s767_s4] sm:$0x3]  ;;  %s637_s11 = scalar_lea.vmem %s763_s0, %s555_s8  ;;  %s642_s14 = scalar_lea.vmem %s764_s1, %s555_s8  ;;  %v644_v5 = vperm.slane %v331_v1, 0  ;;  %v656_v12 = vperm.slane %v331_v1, 1 }
   0xe   : > { %v415_v3 = vld [vmem:[%s768_s5] sm:$0x3]  ;;  %v646_v6 = vperm.slane %v377_v2, 0  ;;  %v650_v8 = vperm.slane %v377_v2, 1  ;;  %v286_v14 = vld [vmem:[%s637_s11 + $0x8] sm:$0xff]  ;;  %v287_v24 = vld [vmem:[%s637_s11 + $0x10] sm:$0xff]  ;;  %s689_s18 = scalar_lea.vmem %s769_s6, %s557_s15 }
   0xf   : > { %v285_v9 = vld [vmem:[%s637_s11] sm:$0xff]  ;;  %v654_v11 = vperm.slane %v415_v3, 0  ;;  %v658_v13 = vperm.slane %v415_v3, 1  ;;  %v354_v19 = vld [vmem:[%s642_s14 + $0x8] sm:$0xff]  ;;  %v295_v20 = vunpack.c.l.bf16 %v286_v14  ;;  %v296_v22 = vunpack.c.h.bf16 %v286_v14  ;;  %v355_v25 = vld [vmem:[%s642_s14 + $0x10] sm:$0xff] }
  0x10   : > { %v353_v10 = vld [vmem:[%s642_s14] sm:$0xff]  ;;  %v293_v15 = vunpack.c.l.bf16 %v285_v9  ;;  %v294_v17 = vunpack.c.h.bf16 %v285_v9  ;;  %v363_v21 = vunpack.c.l.bf16 %v354_v19  ;;  %v364_v23 = vunpack.c.h.bf16 %v354_v19  ;;  %v288_v42 = vld [vmem:[%s637_s11 + $0x18] sm:$0xff] }
  0x11   : > { %v361_v16 = vunpack.c.l.bf16 %v353_v10  ;;  %v362_v18 = vunpack.c.h.bf16 %v353_v10  ;;  %v317_v30 = vmul.f32 %v632_v4, %v295_v20  ;;  %v318_v32 = vmul.f32 %v648_v7, %v296_v22  ;;  %v356_v47 = vld [vmem:[%s642_s14 + $0x18] sm:$0xff]  ;;  %v289_v0 = vld [vmem:[%s637_s11 + $0x20] sm:$0xff]  ;;  %v290_v22 = vld [vmem:[%s637_s11 + $0x28] sm:$0xff] }
  0x12   : > { %v315_v26 = vmul.f32 %v632_v4, %v293_v15  ;;  %v316_v28 = vmul.f32 %v648_v7, %v294_v17  ;;  %v385_v31 = vmul.f32 %v646_v6, %v363_v21  ;;  %v386_v33 = vmul.f32 %v650_v8, %v364_v23  ;;  %v357_v1 = vld [vmem:[%s642_s14 + $0x20] sm:$0xff] }
  0x13   : > { %v383_v27 = vmul.f32 %v646_v6, %v361_v16  ;;  %v384_v29 = vmul.f32 %v650_v8, %v362_v18  ;;  %v297_v36 = vunpack.c.l.bf16 %v287_v24  ;;  %v365_v37 = vunpack.c.l.bf16 %v355_v25 }
  0x14   : > { %v337_v34 = vadd.f32 %v644_v5, %v315_v26  ;;  %v338_v35 = vadd.f32 %v656_v12, %v316_v28  ;;  %v339_v38 = vadd.f32 %v644_v5, %v317_v30  ;;  %v340_v39 = vadd.f32 %v656_v12, %v318_v32 }
  0x15   : > { %v298_v40 = vunpack.c.h.bf16 %v287_v24  ;;  %v366_v41 = vunpack.c.h.bf16 %v355_v25  ;;  %v319_v45 = vmul.f32 %v632_v4, %v297_v36  ;;  %v387_v46 = vmul.f32 %v646_v6, %v365_v37 }
  0x16   : > { %v399_v43 = vadd.f32 %v383_v27, %v337_v34  ;;  %v400_v44 = vadd.f32 %v384_v29, %v338_v35  ;;  %v401_v48 = vadd.f32 %v385_v31, %v339_v38  ;;  %v402_v49 = vadd.f32 %v386_v33, %v340_v39  ;;  %v358_v27 = vld [vmem:[%s642_s14 + $0x28] sm:$0xff] }
  0x17   : > { %v320_v50 = vmul.f32 %v648_v7, %v298_v40  ;;  %v388_v51 = vmul.f32 %v650_v8, %v366_v41  ;;  %v341_v54 = vadd.f32 %v644_v5, %v319_v45  ;;  %v299_v55 = vunpack.c.l.bf16 %v288_v42  ;;  %v291_v40 = vld [vmem:[%s637_s11 + $0x30] sm:$0xff] }
  0x18   : > { %v421_v52 = vadd.f32 %v654_v11, %v399_v43  ;;  %v422_v53 = vadd.f32 %v658_v13, %v400_v44  ;;  %v423_v56 = vadd.f32 %v654_v11, %v401_v48  ;;  %v424_v57 = vadd.f32 %v658_v13, %v402_v49  ;;  %v359_v45 = vld [vmem:[%s642_s14 + $0x30] sm:$0xff] }
  0x19   : > { %v342_v58 = vadd.f32 %v656_v12, %v320_v50  ;;  %v367_v59 = vunpack.c.l.bf16 %v356_v47  ;;  %v403_v62 = vadd.f32 %v387_v46, %v341_v54  ;;  %v321_v63 = vmul.f32 %v632_v4, %v299_v55 }
  0x1a   : > { %v437_v60 = vmax.f32 %v421_v52, 0.0  ;;  %v438_v61 = vmax.f32 %v422_v53, 0.0  ;;  %v439_v2 = vmax.f32 %v423_v56, 0.0  ;;  %v440_v3 = vmax.f32 %v424_v57, 0.0 }
  0x1b   : > { %v404_v9 = vadd.f32 %v388_v51, %v342_v58  ;;  %v389_v10 = vmul.f32 %v646_v6, %v367_v59  ;;  %v425_v14 = vadd.f32 %v654_v11, %v403_v62  ;;  %v343_v15 = vadd.f32 %v644_v5, %v321_v63  ;;  %v292_v62 = vld [vmem:[%s637_s11 + $0x38] sm:$0xff] }
  0x1c   : > { %453 = vst [vmem:[%s689_s18] sm:$0xff] %v437_v60  ;;  %v300_v16 = vunpack.c.h.bf16 %v288_v42  ;;  %v368_v17 = vunpack.c.h.bf16 %v356_v47  ;;  %v301_v19 = vunpack.c.l.bf16 %v289_v0  ;;  %v369_v20 = vunpack.c.l.bf16 %v357_v1  ;;  %v360_v63 = vld [vmem:[%s642_s14 + $0x38] sm:$0xff] }
  0x1d   : > { %454 = vst [vmem:[%s689_s18 + $0x8] sm:$0xff] %v438_v61  ;;  %v426_v18 = vadd.f32 %v658_v13, %v404_v9  ;;  %v302_v21 = vunpack.c.h.bf16 %v289_v0  ;;  %v441_v23 = vmax.f32 %v425_v14, 0.0  ;;  %v405_v24 = vadd.f32 %v389_v10, %v343_v15 }
  0x1e   : > { %455 = vst [vmem:[%s689_s18 + $0x10] sm:$0xff] %v439_v2  ;;  %v322_v25 = vmul.f32 %v648_v7, %v300_v16  ;;  %v390_v26 = vmul.f32 %v650_v8, %v368_v17  ;;  %v323_v29 = vmul.f32 %v632_v4, %v301_v19  ;;  %v391_v30 = vmul.f32 %v646_v6, %v369_v20 }
  0x1f   : > { %456 = vst [vmem:[%s689_s18 + $0x18] sm:$0xff] %v440_v3  ;;  %v442_v28 = vmax.f32 %v426_v18, 0.0  ;;  %v324_v31 = vmul.f32 %v648_v7, %v302_v21  ;;  %v427_v32 = vadd.f32 %v654_v11, %v405_v24  ;;  %v370_v34 = vunpack.c.h.bf16 %v357_v1 }
  0x20   : > { %457 = vst [vmem:[%s689_s18 + $0x20] sm:$0xff] %v441_v23  ;;  %v344_v33 = vadd.f32 %v656_v12, %v322_v25  ;;  %v303_v35 = vunpack.c.l.bf16 %v290_v22  ;;  %v345_v36 = vadd.f32 %v644_v5, %v323_v29  ;;  %v371_v38 = vunpack.c.l.bf16 %v358_v27 }
  0x21   : > { %458 = vst [vmem:[%s689_s18 + $0x28] sm:$0xff] %v442_v28  ;;  %v346_v37 = vadd.f32 %v656_v12, %v324_v31  ;;  %v304_v39 = vunpack.c.h.bf16 %v290_v22  ;;  %v443_v41 = vmax.f32 %v427_v32, 0.0  ;;  %v392_v43 = vmul.f32 %v650_v8, %v370_v34 }
  0x22   : > { %v406_v42 = vadd.f32 %v390_v26, %v344_v33  ;;  %v325_v44 = vmul.f32 %v632_v4, %v303_v35  ;;  %v407_v46 = vadd.f32 %v391_v30, %v345_v36  ;;  %v393_v47 = vmul.f32 %v646_v6, %v371_v38 }
  0x23   : > { %v326_v48 = vmul.f32 %v648_v7, %v304_v39  ;;  %v372_v49 = vunpack.c.h.bf16 %v358_v27  ;;  %459 = vst [vmem:[%s689_s18 + $0x30] sm:$0xff] %v443_v41  ;;  %v408_v51 = vadd.f32 %v392_v43, %v346_v37  ;;  %v305_v53 = vunpack.c.l.bf16 %v291_v40 }
  0x24   : > { %v428_v50 = vadd.f32 %v658_v13, %v406_v42  ;;  %v347_v52 = vadd.f32 %v644_v5, %v325_v44  ;;  %v429_v54 = vadd.f32 %v654_v11, %v407_v46  ;;  %v373_v57 = vunpack.c.l.bf16 %v359_v45 }
  0x25   : > { %v348_v55 = vadd.f32 %v656_v12, %v326_v48  ;;  %v394_v56 = vmul.f32 %v650_v8, %v372_v49  ;;  %v430_v59 = vadd.f32 %v658_v13, %v408_v51  ;;  %v327_v61 = vmul.f32 %v632_v4, %v305_v53 }
  0x26   : > { %v444_v58 = vmax.f32 %v428_v50, 0.0  ;;  %v409_v60 = vadd.f32 %v393_v47, %v347_v52  ;;  %v445_v0 = vmax.f32 %v429_v54, 0.0  ;;  %v395_v2 = vmul.f32 %v646_v6, %v373_v57 }
  0x27   : > { %v410_v1 = vadd.f32 %v394_v56, %v348_v55  ;;  %v306_v3 = vunpack.c.h.bf16 %v291_v40  ;;  %v446_v9 = vmax.f32 %v430_v59, 0.0  ;;  %v349_v14 = vadd.f32 %v644_v5, %v327_v61 }
  0x28   : > { %460 = vst [vmem:[%s689_s18 + $0x38] sm:$0xff] %v444_v58  ;;  %v431_v10 = vadd.f32 %v654_v11, %v409_v60  ;;  %v374_v15 = vunpack.c.h.bf16 %v359_v45  ;;  %v307_v18 = vunpack.c.l.bf16 %v292_v62  ;;  %v375_v19 = vunpack.c.l.bf16 %v360_v63 }
  0x29   : > { %461 = vst [vmem:[%s689_s18 + $0x40] sm:$0xff] %v445_v0  ;;  %v432_v16 = vadd.f32 %v658_v13, %v410_v1  ;;  %v328_v17 = vmul.f32 %v648_v7, %v306_v3  ;;  %v411_v21 = vadd.f32 %v395_v2, %v349_v14  ;;  %v308_v23 = vunpack.c.h.bf16 %v292_v62 }
  0x2a   : > { %462 = vst [vmem:[%s689_s18 + $0x48] sm:$0xff] %v446_v9  ;;  %v447_v20 = vmax.f32 %v431_v10, 0.0  ;;  %v396_v22 = vmul.f32 %v650_v8, %v374_v15  ;;  %v329_v26 = vmul.f32 %v632_v4, %v307_v18  ;;  %v397_v27 = vmul.f32 %v646_v6, %v375_v19 }
  0x2b   : > { %v448_v24 = vmax.f32 %v432_v16, 0.0  ;;  %v350_v25 = vadd.f32 %v656_v12, %v328_v17  ;;  %v433_v28 = vadd.f32 %v654_v11, %v411_v21  ;;  %v330_v29 = vmul.f32 %v648_v7, %v308_v23 }
  0x2c   : > { %463 = vst [vmem:[%s689_s18 + $0x50] sm:$0xff] %v447_v20  ;;  %v376_v30 = vunpack.c.h.bf16 %v360_v63  ;;  %v351_v32 = vadd.f32 %v644_v5, %v329_v26 }
  0x2d   : > { %464 = vst [vmem:[%s689_s18 + $0x58] sm:$0xff] %v448_v24  ;;  %v412_v31 = vadd.f32 %v396_v22, %v350_v25  ;;  %v449_v33 = vmax.f32 %v433_v28, 0.0  ;;  %v352_v34 = vadd.f32 %v656_v12, %v330_v29 }
  0x2e   : > { %v398_v4 = vmul.f32 %v650_v8, %v376_v30  ;;  %v413_v35 = vadd.f32 %v397_v27, %v351_v32 }
  0x2f   : > { %v434_v6 = vadd.f32 %v658_v13, %v412_v31  ;;  %465 = vst [vmem:[%s689_s18 + $0x60] sm:$0xff] %v449_v33 }
  0x30   : > { %v414_v36 = vadd.f32 %v398_v4, %v352_v34  ;;  %v435_v7 = vadd.f32 %v654_v11, %v413_v35 }
  0x31   : > { %v450_v37 = vmax.f32 %v434_v6, 0.0 }
  0x32   : > { %v436_v38 = vadd.f32 %v658_v13, %v414_v36  ;;  %v451_v39 = vmax.f32 %v435_v7, 0.0 }
  0x33   : > { %466 = vst [vmem:[%s689_s18 + $0x68] sm:$0xff] %v450_v37 }
  0x34   : > { %v452_v40 = vmax.f32 %v436_v38, 0.0  ;;  %467 = vst [vmem:[%s689_s18 + $0x70] sm:$0xff] %v451_v39 }
  0x36   : > { %468 = vst [vmem:[%s689_s18 + $0x78] sm:$0xff] %v452_v40 }
  0x37 PF: > { %s16_s21 = sadd.s32 1, %s572_s21  }
  0x38   : > { %p13_p4 = scmp.ge.s32.totalorder %s16_s21, 4  }
  0x3a   :  { %15 = sbr.rel (!%p13_p4) target bundleno = 1 (0x1), region = 77 }

// kernel: basic_block_forward.8
= control target key start
LH: loop header
LB: loop body
LE: loop exit
PB: predicated region body
PF: predicated region fallthrough
CT: control target
= control target key end

     0   :  { %s1011_s12 = smov 0   ;;  %s1013_s13 = smov 0   ;;  %s1162_s0 = inlined_call_operand.vmem [shape: bf16[128,128], index: 0, kind: input, shape index: {}]   ;;  %s1163_s1 = inlined_call_operand.vmem [shape: bf16[128,256], index: 1, kind: input, shape index: {}]   ;;  %s1164_s2 = inlined_call_operand.vmem [shape: bf16[128,256], index: 2, kind: output, shape index: {0}]   ;;  %s1165_s3 = inlined_call_operand.vmem [shape: f32[2,2,256], index: 3, kind: output, shape index: {1}]  }
   0x1   :  { %s1015_s14 = smov 0  }
   0x2 LB: > { %s33_s15 = sadd.s32 1, %s985_s13  ;;  %p815_p0 = scmp.ge.s32.totalorder %s989_s14, 1  ;;  %s989_s14 = sphi %s1015_s14, %s14_s14   ;;  %s985_s13 = sphi %s1013_s13, %s1167_s13   ;;  %s981_s12 = sphi %s1011_s12, %s1166_s12  }
   0x3   : > { %p35_p1 = scmp.ge.s32.totalorder %s33_s15, 2  ;;  %p188_p2 = scmp.lt.s32.totalorder %s989_s14, 3 }
   0x5   : > { %s1169_s15 = smov (%p35_p1, %s33_s15), 0  ;;  %p189_p3 = pnand %p815_p0, %p188_p2 }
   0x6   : > { %s816_s6 = sshll.u32 (!%p189_p3), %s981_s12, 3  ;;  %p273_p5 = scmp.lt.s32.totalorder (!%p189_p3), %s981_s12, 1 }
   0x7   : > { %192 = sbr.rel (%p189_p3) target bundleno = 226 (0xe2), region = 28  ;;  %p240_p4 = scmp.lt.s32.totalorder (!%p189_p3), %s816_s6, 15 }
   0xc   : > { %v897_v0 = vld [vmem:[%s1163_s1 + $0x70] sm:$0xf]  ;;  %v926_v1 = vld [vmem:[%s1163_s1 + $0x74] sm:$0xf0]  ;;  %v925_v2 = vld [vmem:[%s1163_s1 + $0x74] sm:$0xf] }
   0xd   : > { %v898_v3 = vor.u32 %v926_v1, %v897_v0  ;;  %v899_v4 = vld [vmem:[%s1163_s1 + $0x78] sm:$0xf0]  ;;  %v889_v5 = vld [vmem:[%s1163_s1 + $0x60] sm:$0xf]  ;;  %v924_v6 = vld [vmem:[%s1163_s1 + $0x64] sm:$0xf0] }
   0xe   : > { %v902_v7 = vor.u32 %v925_v2, %v899_v4  ;;  %v923_v8 = vld [vmem:[%s1163_s1 + $0x64] sm:$0xf]  ;;  %v891_v9 = vld [vmem:[%s1163_s1 + $0x68] sm:$0xf0]  ;;  %v890_v10 = vor.u32 %v924_v6, %v889_v5  ;;  %v881_v12 = vld [vmem:[%s1163_s1 + $0x50] sm:$0xf] }
   0xf   : > { %446 = vmatpush.bf16.msra.mxu0 %v898_v3  ;;  %927 = vmatpush.bf16.msra.mxu2 %v898_v3  ;;  %v894_v11 = vor.u32 %v923_v8, %v891_v9  ;;  %v922_v13 = vld [vmem:[%s1163_s1 + $0x54] sm:$0xf0]  ;;  %v921_v14 = vld [vmem:[%s1163_s1 + $0x54] sm:$0xf]  ;;  %v883_v15 = vld [vmem:[%s1163_s1 + $0x58] sm:$0xf0] }
  0x10   : > { %475 = vmatpush.bf16.msra.mxu1 %v902_v7  ;;  %935 = vmatpush.bf16.msra.mxu3 %v902_v7  ;;  %v882_v16 = vor.u32 %v922_v13, %v881_v12  ;;  %v886_v17 = vor.u32 %v921_v14, %v883_v15  ;;  %v873_v18 = vld [vmem:[%s1163_s1 + $0x40] sm:$0xf]  ;;  %v920_v19 = vld [vmem:[%s1163_s1 + $0x44] sm:$0xf0]  ;;  %v919_v20 = vld [vmem:[%s1163_s1 + $0x44] sm:$0xf] }
  0x11   : > { %v875_v21 = vld [vmem:[%s1163_s1 + $0x48] sm:$0xf0]  ;;  %v874_v22 = vor.u32 %v920_v19, %v873_v18  ;;  %v865_v24 = vld [vmem:[%s1163_s1 + $0x30] sm:$0xf]  ;;  %v918_v25 = vld [vmem:[%s1163_s1 + $0x34] sm:$0xf0] }
  0x12   : > { %v878_v23 = vor.u32 %v919_v20, %v875_v21  ;;  %v917_v26 = vld [vmem:[%s1163_s1 + $0x34] sm:$0xf]  ;;  %v867_v27 = vld [vmem:[%s1163_s1 + $0x38] sm:$0xf0]  ;;  %v866_v28 = vor.u32 %v918_v25, %v865_v24  ;;  %v857_v30 = vld [vmem:[%s1163_s1 + $0x20] sm:$0xf] }
  0x13   : > { %447 = vmatpush.bf16.msra.mxu0 %v890_v10  ;;  %928 = vmatpush.bf16.msra.mxu2 %v890_v10  ;;  %v870_v29 = vor.u32 %v917_v26, %v867_v27  ;;  %v916_v31 = vld [vmem:[%s1163_s1 + $0x24] sm:$0xf0]  ;;  %v915_v32 = vld [vmem:[%s1163_s1 + $0x24] sm:$0xf]  ;;  %v859_v33 = vld [vmem:[%s1163_s1 + $0x28] sm:$0xf0] }
  0x14   : > { %476 = vmatpush.bf16.msra.mxu1 %v894_v11  ;;  %936 = vmatpush.bf16.msra.mxu3 %v894_v11  ;;  %v858_v34 = vor.u32 %v916_v31, %v857_v30  ;;  %v862_v35 = vor.u32 %v915_v32, %v859_v33  ;;  %v849_v36 = vld [vmem:[%s1163_s1 + $0x10] sm:$0xf]  ;;  %v914_v37 = vld [vmem:[%s1163_s1 + $0x14] sm:$0xf0]  ;;  %s1171_s6 = smov (!%p240_p4, %s816_s6), 15  ;;  %s1173_s12 = smov (!%p273_p5, %s981_s12), 1 }
  0x15   : > { %v913_v38 = vld [vmem:[%s1163_s1 + $0x14] sm:$0xf]  ;;  %v851_v39 = vld [vmem:[%s1163_s1 + $0x18] sm:$0xf0]  ;;  %v850_v40 = vor.u32 %v914_v37, %v849_v36  ;;  %v841_v42 = vld [vmem:[%s1163_s1] sm:$0xf] }
  0x16   : > { %v854_v41 = vor.u32 %v913_v38, %v851_v39  ;;  %v912_v43 = vld [vmem:[%s1163_s1 + $0x4] sm:$0xf0]  ;;  %s817_s4 = sshll.u32 %s1171_s6, 2  ;;  %v911_v44 = vld [vmem:[%s1163_s1 + $0x4] sm:$0xf]  ;;  %s905_s17 = sshll.u32 %s1171_s6, 3 }
  0x17   : > { %448 = vmatpush.bf16.msra.mxu0 %v882_v16  ;;  %929 = vmatpush.bf16.msra.mxu2 %v882_v16  ;;  %v843_v45 = vld [vmem:[%s1163_s1 + $0x8] sm:$0xf0]  ;;  %v842_v46 = vor.u32 %v912_v43, %v841_v42  ;;  %s246_s16 = scalar_lea.vmem %s1162_s0, %s817_s4  ;;  %s1138_s20 = scalar_lea.vmem %s1164_s2, %s905_s17  ;;  %vm639_vm0 = vcmask 1040384   ;;  %vm645_vm1 = vcmask 1041408  }
  0x18   : > { %477 = vmatpush.bf16.msra.mxu1 %v886_v17  ;;  %937 = vmatpush.bf16.msra.mxu3 %v886_v17  ;;  %v846_v47 = vor.u32 %v911_v44, %v843_v45  ;;  %v907_v48 = vld [vmem:[%s246_s16] sm:$0xff]  ;;  %v909_v49 = vld [vmem:[%s246_s16 + $0x10] sm:$0xff]  ;;  %v908_v50 = vld [vmem:[%s246_s16 + $0x8] sm:$0xff]  ;;  %s906_s6 = sshll.u32 %s1173_s12, 2 }
  0x19   : > { %v910_v51 = vld [vmem:[%s246_s16 + $0x18] sm:$0xff]  ;;  %s280_s23 = scalar_lea.vmem %s1165_s3, %s906_s6 }
  0x1b   : > { %449 = vmatpush.bf16.msra.mxu0 %v874_v22  ;;  %930 = vmatpush.bf16.msra.mxu2 %v874_v22 }
  0x1c   : > { %478 = vmatpush.bf16.msra.mxu1 %v878_v23  ;;  %938 = vmatpush.bf16.msra.mxu3 %v878_v23 }
  0x1f   : > { %450 = vmatpush.bf16.msra.mxu0 %v866_v28  ;;  %931 = vmatpush.bf16.msra.mxu2 %v866_v28 }
  0x20   : > { %479 = vmatpush.bf16.msra.mxu1 %v870_v29  ;;  %939 = vmatpush.bf16.msra.mxu3 %v870_v29 }
  0x23   : > { %451 = vmatpush.bf16.msra.mxu0 %v858_v34  ;;  %932 = vmatpush.bf16.msra.mxu2 %v858_v34 }
  0x24   : > { %480 = vmatpush.bf16.msra.mxu1 %v862_v35  ;;  %940 = vmatpush.bf16.msra.mxu3 %v862_v35 }
  0x27   : > { %452 = vmatpush.bf16.msra.mxu0 %v850_v40  ;;  %933 = vmatpush.bf16.msra.mxu2 %v850_v40 }
  0x28   : > { %481 = vmatpush.bf16.msra.mxu1 %v854_v41  ;;  %941 = vmatpush.bf16.msra.mxu3 %v854_v41 }
  0x2b   : > { %453 = vmatpush.bf16.msra.mxu0 %v842_v46  ;;  %934 = vmatpush.bf16.msra.mxu2 %v842_v46 }
  0x2c   : > { %482 = vmatpush.bf16.msra.mxu1 %v846_v47  ;;  %942 = vmatpush.bf16.msra.mxu3 %v846_v47 }
  0x2e   : > { %454 = vmatmul.bf16.vlgmr.msra.gmra.mxu0 %v907_v48  ;;  %464 = vmatmul.bf16.vlgmr.msra.gmra.mxu2 %v909_v49 }
  0x2f   : > { %483 = vmatmul.bf16.vlgmr.msra.gmra.mxu1 %v907_v48  ;;  %493 = vmatmul.bf16.vlgmr.msra.gmra.mxu3 %v909_v49 }
  0x3e   : > { %459 = vmatmul.bf16.gmra.mxu0 %v908_v50  ;;  %469 = vmatmul.bf16.gmra.mxu2 %v910_v51 }
  0x3f   : > { %488 = vmatmul.bf16.gmra.mxu1 %v908_v50  ;;  %498 = vmatmul.bf16.gmra.mxu3 %v910_v51 }
  0xab   : > { %v455_v52 = vpop.f32.mrf.mxu0 }
  0xac   : > { %v484_v53 = vpop.f32.mrf.mxu1  ;;  %v597_v5 = vmul.f32 %v455_v52, %v455_v52 }
  0xad   : > { %v555_v54 = vpack.c.bf16 %v484_v53, %v455_v52  ;;  %v598_v8 = vmul.f32 %v484_v53, %v484_v53 }
  0xaf   : > { %563 = vst [vmem:[%s1138_s20] sm:$0xff] %v555_v54 }
  0xb1   : > { %v465_v55 = vpop.f32.mrf.mxu2 }
  0xb2   : > { %v494_v56 = vpop.f32.mrf.mxu3  ;;  %v605_v27 = vmul.f32 %v465_v55, %v465_v55 }
  0xb3   : > { %v559_v57 = vpack.c.bf16 %v494_v56, %v465_v55  ;;  %v457_v58 = vpop.f32.mrf.mxu0  ;;  %v606_v30 = vmul.f32 %v494_v56, %v494_v56 }
  0xb4   : > { %v486_v59 = vpop.f32.mrf.mxu1  ;;  %v599_v3 = vmul.f32 %v457_v58, %v457_v58  ;;  %v571_v6 = vadd.f32 %v457_v58, %v455_v52 }
  0xb5   : > { %567 = vst [vmem:[%s1138_s20 + $0x20] sm:$0xff] %v559_v57  ;;  %v556_v60 = vpack.c.bf16 %v486_v59, %v457_v58  ;;  %v600_v4 = vmul.f32 %v486_v59, %v486_v59  ;;  %v584_v9 = vadd.f32 %v486_v59, %v484_v53 }
  0xb6   : > { %v613_v12 = vadd.f32 %v599_v3, %v597_v5 }
  0xb7   : > { %564 = vst [vmem:[%s1138_s20 + $0x8] sm:$0xff] %v556_v60  ;;  %v626_v15 = vadd.f32 %v600_v4, %v598_v8 }
  0xb9   : > { %v467_v61 = vpop.f32.mrf.mxu2 }
  0xba   : > { %v496_v62 = vpop.f32.mrf.mxu3  ;;  %v607_v33 = vmul.f32 %v467_v61, %v467_v61 }
  0xbb   : > { %v560_v63 = vpack.c.bf16 %v496_v62, %v467_v61  ;;  %v460_v0 = vpop.f32.mrf.mxu0  ;;  %v608_v36 = vmul.f32 %v496_v62, %v496_v62 }
  0xbc   : > { %v489_v1 = vpop.f32.mrf.mxu1  ;;  %v601_v7 = vmul.f32 %v460_v0, %v460_v0  ;;  %v572_v13 = vadd.f32 %v571_v6, %v460_v0 }
  0xbd   : > { %568 = vst [vmem:[%s1138_s20 + $0x28] sm:$0xff] %v560_v63  ;;  %v557_v2 = vpack.c.bf16 %v489_v1, %v460_v0  ;;  %v602_v10 = vmul.f32 %v489_v1, %v489_v1  ;;  %v585_v16 = vadd.f32 %v584_v9, %v489_v1 }
  0xbe   : > { %v614_v19 = vadd.f32 %v613_v12, %v601_v7 }
  0xbf   : > { %565 = vst [vmem:[%s1138_s20 + $0x10] sm:$0xff] %v557_v2  ;;  %v627_v23 = vadd.f32 %v626_v15, %v602_v10 }
  0xc1   : > { %v470_v11 = vpop.f32.mrf.mxu2 }
  0xc2   : > { %v499_v14 = vpop.f32.mrf.mxu3  ;;  %v609_v40 = vmul.f32 %v470_v11, %v470_v11 }
  0xc3   : > { %v561_v17 = vpack.c.bf16 %v499_v14, %v470_v11  ;;  %v462_v18 = vpop.f32.mrf.mxu0  ;;  %v610_v44 = vmul.f32 %v499_v14, %v499_v14 }
  0xc4   : > { %v573_v20 = vadd.f32 %v572_v13, %v462_v18  ;;  %v603_v21 = vmul.f32 %v462_v18, %v462_v18  ;;  %v491_v22 = vpop.f32.mrf.mxu1 }
  0xc5   : > { %569 = vst [vmem:[%s1138_s20 + $0x30] sm:$0xff] %v561_v17  ;;  %v558_v24 = vpack.c.bf16 %v491_v22, %v462_v18  ;;  %v586_v25 = vadd.f32 %v585_v16, %v491_v22  ;;  %v604_v26 = vmul.f32 %v491_v22, %v491_v22 }
  0xc6   : > { %v574_v28 = vadd.f32 %v573_v20, %v465_v55  ;;  %v615_v29 = vadd.f32 %v614_v19, %v603_v21 }
  0xc7   : > { %566 = vst [vmem:[%s1138_s20 + $0x18] sm:$0xff] %v558_v24  ;;  %v587_v31 = vadd.f32 %v586_v25, %v494_v56  ;;  %v628_v32 = vadd.f32 %v627_v23, %v604_v26 }
  0xc8   : > { %v616_v34 = vadd.f32 %v615_v29, %v605_v27  ;;  %v575_v35 = vadd.f32 %v574_v28, %v467_v61 }
  0xc9   : > { %v629_v37 = vadd.f32 %v628_v32, %v606_v30  ;;  %v472_v38 = vpop.f32.mrf.mxu2  ;;  %v588_v39 = vadd.f32 %v587_v31, %v496_v62 }
  0xca   : > { %v576_v41 = vadd.f32 %v575_v35, %v470_v11  ;;  %v617_v42 = vadd.f32 %v616_v34, %v607_v33  ;;  %v501_v43 = vpop.f32.mrf.mxu3  ;;  %v611_v49 = vmul.f32 %v472_v38, %v472_v38 }
  0xcb   : > { %v562_v45 = vpack.c.bf16 %v501_v43, %v472_v38  ;;  %v589_v46 = vadd.f32 %v588_v39, %v499_v14  ;;  %v630_v47 = vadd.f32 %v629_v37, %v608_v36  ;;  %v612_v52 = vmul.f32 %v501_v43, %v501_v43 }
  0xcc   : > { %v577_v48 = vadd.f32 %v576_v41, %v472_v38  ;;  %v618_v50 = vadd.f32 %v617_v42, %v609_v40 }
  0xcd   : > { %570 = vst [vmem:[%s1138_s20 + $0x38] sm:$0xff] %v562_v45  ;;  %v590_v51 = vadd.f32 %v589_v46, %v501_v43  ;;  %v631_v53 = vadd.f32 %v630_v47, %v610_v44 }
  0xce   : > { %v578_v54 = vrot.slane %v577_v48, 4  ;;  %v619_v55 = vadd.f32 %v618_v50, %v611_v49 }
  0xcf   : > { %v591_v56 = vrot.slane %v590_v51, 4  ;;  %v632_v57 = vadd.f32 %v631_v53, %v612_v52 }
  0xd0   : > { %v579_v58 = vadd.f32 %v578_v54, %v577_v48  ;;  %v620_v59 = vrot.slane %v619_v55, 4 }
  0xd1   : > { %v592_v60 = vadd.f32 %v591_v56, %v590_v51  ;;  %v633_v61 = vrot.slane %v632_v57, 4 }
  0xd2   : > { %v580_v62 = vrot.slane %v579_v58, 2  ;;  %v621_v63 = vadd.f32 %v620_v59, %v619_v55 }
  0xd3   : > { %v593_v0 = vrot.slane %v592_v60, 2  ;;  %v634_v1 = vadd.f32 %v633_v61, %v632_v57 }
  0xd4   : > { %v622_v2 = vrot.slane %v621_v63, 2  ;;  %v581_v3 = vadd.f32 %v580_v62, %v579_v58 }
  0xd5   : > { %v594_v4 = vadd.f32 %v593_v0, %v592_v60  ;;  %v635_v5 = vrot.slane %v634_v1, 2 }
  0xd6   : > { %v623_v6 = vadd.f32 %v622_v2, %v621_v63  ;;  %v582_v10 = vrot.slane %v581_v3, 1 }
  0xd7   : > { %v595_v7 = vrot.slane %v594_v4, 1  ;;  %v636_v8 = vadd.f32 %v635_v5, %v634_v1 }
  0xd8   : > { %v624_v9 = vrot.slane %v623_v6, 1  ;;  %v583_v15 = vadd.f32 %v582_v10, %v581_v3 }
  0xd9   : > { %v637_v11 = vrot.slane %v636_v8, 1  ;;  %v596_v13 = vadd.f32 %v595_v7, %v594_v4 }
  0xda   : > { %v625_v12 = vadd.f32 %v624_v9, %v623_v6 }
  0xdb   : > { %v638_v14 = vadd.f32 %v637_v11, %v636_v8 }
  0xdc   : > { %v640_v18 = vsel %vm639_vm0, %v583_v15, %v625_v12 }
  0xdd   : > { %v641_v16 = vsel %vm639_vm0, %v596_v13, %v638_v14 }
  0xde   : > { %v644_v17 = vrot.slane %v641_v16, 6 }
  0xe0   : > { %v646_v19 = vsel %vm645_vm1, %v640_v18, %v644_v17 }
  0xe1   : > { %648 = vst [vmem:[%s280_s23] sm:$0xf] %v646_v19 }
  0xe2 PF: > { %s14_s14 = sadd.s32 1, %s989_s14   ;;  %s1166_s12 = smov %s985_s13 }
  0xe3   : > { %p11_p6 = scmp.ge.s32.totalorder %s14_s14, 4   ;;  %s1167_s13 = smov %s1169_s15 }
  0xe5   :  { %13 = sbr.rel (!%p11_p6) target bundleno = 2 (0x2), region = 81 }

</bundles_post_ra>
